<compile_context>
chip_gen: v7x
topology: tpu7x:2x2x1
jax: 0.10.0
libtpu: 0.0.40
codegen_flags: <defaults>
</compile_context>

<pallas_src>
import jax
import jax.numpy as jnp
from jax.experimental import pallas as pl
from jax.experimental.pallas import tpu as pltpu


def _nonlocal_kernel(x_ref, wgtp_ref, bgtp_ref, ww_ref, bw_ref, o_ref):
    # One grid step = (Gb, N, C) batch of token slabs.
    Gb, N, C = x_ref.shape
    IC = ww_ref.shape[0]

    x = x_ref[...]                                      # (Gb, N, C) f32
    x2 = x.reshape(Gb * N, C)

    # Fused g / theta / phi 1x1 convs: one (Gb*N, C) @ (C, 3*IC) MXU matmul.
    gtp = jnp.dot(x2, wgtp_ref[...],
                  preferred_element_type=jnp.float32) + bgtp_ref[...]
    gtp = gtp.reshape(Gb, N, 3 * IC)
    g = gtp[..., 0 * IC:1 * IC]                         # (Gb, N, IC)
    th = gtp[..., 1 * IC:2 * IC]
    ph = gtp[..., 2 * IC:3 * IC]

    # Embedded-gaussian attention scores: contraction over IC, no explicit .T.
    f = jnp.einsum("gnc,gmc->gnm", th, ph,
                   preferred_element_type=jnp.float32)  # (Gb, N, N)
    f = f - jnp.max(f, axis=-1, keepdims=True)
    e = jnp.exp(f)
    rowsum = jnp.sum(e, axis=-1, keepdims=True)         # (Gb, N, 1)

    # Deferred softmax normalization: scale the (N, IC) result, not the (N, N)
    # score matrix.  (approx=True would route the reciprocal to the EUP; kept
    # exact here so the f32 reference check stays tight.)
    y = jnp.einsum("gnm,gmc->gnc", e, g,
                   preferred_element_type=jnp.float32)  # (Gb, N, IC)
    y = y * pl.reciprocal(rowsum)

    # W conv with eval-mode BatchNorm folded in (done in the wrapper), then
    # the residual connection.
    wy = jnp.dot(y.reshape(Gb * N, IC), ww_ref[...],
                 preferred_element_type=jnp.float32) + bw_ref[...]
    o_ref[...] = (wy.reshape(Gb, N, C) + x).astype(o_ref.dtype)


def fuse_params(params, eps=1e-5):
    """Concat g/theta/phi weights; fold eval-mode BatchNorm into the W conv."""
    s = params["gamma"] * jax.lax.rsqrt(params["var"] + eps)            # (1, C)
    return dict(
        wgtp_t=jnp.concatenate(
            [params["wg_t"], params["wt_t"], params["wp_t"]], axis=1),  # (C, 3*IC)
        bgtp=jnp.concatenate(
            [params["bg"], params["bt"], params["bp"]], axis=1),        # (1, 3*IC)
        ww_eff=params["ww_t"] * s,                                      # (IC, C)
        bw_eff=(params["bw"] - params["mean"]) * s + params["beta"],    # (1, C)
    )


def nonlocal_block(x4, fused):
    """x4: (G, N, C) token slabs; returns (G, N, C)."""
    G, N, C = x4.shape
    IC3 = fused["wgtp_t"].shape[1]
    IC = fused["ww_eff"].shape[0]

    # 2 parallel grid steps so work can split across both TensorCores on v7x;
    # on single-TC chips (v5e/v6e) the extra step is one cheap prologue.
    n_steps = 2 if G % 2 == 0 else 1
    Gb = G // n_steps

    def rep2(shape):
        return pl.BlockSpec(shape, lambda i: (0, 0))

    return pl.pallas_call(
        _nonlocal_kernel,
        out_shape=jax.ShapeDtypeStruct((G, N, C), x4.dtype),
        grid=(n_steps,),
        in_specs=[
            pl.BlockSpec((Gb, N, C), lambda i: (i, 0, 0)),   # x slabs
            rep2((C, IC3)), rep2((1, IC3)),                  # fused g/theta/phi
            rep2((IC, C)), rep2((1, C)),                     # W conv (BN folded)
        ],
        out_specs=pl.BlockSpec((Gb, N, C), lambda i: (i, 0, 0)),
        input_output_aliases={0: 0},
        compiler_params=pltpu.CompilerParams(
            dimension_semantics=("parallel",)),
    )(x4, fused["wgtp_t"], fused["bgtp"], fused["ww_eff"], fused["bw_eff"])


def rlnl_forward(x, params):
    """x: (B, C, H, W) NCHW, as in the PyTorch module."""
    B, C, H, W = x.shape
    H1, W1 = H // 2, W // 2
    N = H1 * W1
    fused = fuse_params(params)

    # Quadrant split with one reshape + transpose:
    # (B, C, 2, H1, 2, W1) -> (hq, wq, B, H1, W1, C) -> (4*B, N, C).
    x4 = (x.reshape(B, C, 2, H1, 2, W1)
           .transpose(2, 4, 0, 3, 5, 1)
           .reshape(4 * B, N, C))

    z4 = nonlocal_block(x4, fused)                           # (4*B, N, C)

    # Inverse: (4*B, N, C) -> (hq, wq, B, H1, W1, C) -> NCHW.
    out = (z4.reshape(2, 2, B, H1, W1, C)
             .transpose(2, 5, 0, 3, 1, 4)
             .reshape(B, C, H, W))
    return out


def init_params(key, in_feat=64, inter_feat=32):
    """Parameters mirroring the module's shapes.

    Conv weights/biases use PyTorch's default uniform(-1/sqrt(fan_in), ...).
    NOTE: the PyTorch module initializes the BN weight/bias to 0 (so at init
    the block output is exactly x).  Here we draw NONZERO BN
    gamma/beta/mean/var so the self-test exercises the projections, attention
    softmax and BN folding — not just the residual path.
    """
    C, IC = in_feat, inter_feat
    ks = jax.random.split(key, 12)
    bnd_c = 1.0 / jnp.sqrt(jnp.float32(C))
    bnd_ic = 1.0 / jnp.sqrt(jnp.float32(IC))
    u = lambda k, s, b: jax.random.uniform(k, s, jnp.float32, -b, b)
    return dict(
        # Conv weights stored transposed, (in, out), so the kernel does x @ W.
        wg_t=u(ks[0], (C, IC), bnd_c), bg=u(ks[1], (1, IC), bnd_c),
        wt_t=u(ks[2], (C, IC), bnd_c), bt=u(ks[3], (1, IC), bnd_c),
        wp_t=u(ks[4], (C, IC), bnd_c), bp=u(ks[5], (1, IC), bnd_c),
        ww_t=u(ks[6], (IC, C), bnd_ic), bw=u(ks[7], (1, C), bnd_ic),
        gamma=1.0 + 0.1 * jax.random.normal(ks[8], (1, C), jnp.float32),
        beta=0.1 * jax.random.normal(ks[9], (1, C), jnp.float32),
        mean=0.1 * jax.random.normal(ks[10], (1, C), jnp.float32),
        var=1.0 + 0.5 * jax.random.uniform(ks[11], (1, C), jnp.float32),
    )


# ----------------------- pure-JAX reference (for the self-test) --------------
def _nonlocal_ref_nchw(xq, p, eps=1e-5):
    B, C, H1, W1 = xq.shape
    N = H1 * W1
    xs = xq.transpose(0, 2, 3, 1).reshape(B, N, C)
    g = xs @ p["wg_t"] + p["bg"]
    th = xs @ p["wt_t"] + p["bt"]
    ph = xs @ p["wp_t"] + p["bp"]
    f = jnp.einsum("bnc,bmc->bnm", th, ph)
    attn = jax.nn.softmax(f, axis=-1)
    y = jnp.einsum("bnm,bmc->bnc", attn, g)
    wy = y @ p["ww_t"] + p["bw"]
    wy = (wy - p["mean"]) * jax.lax.rsqrt(p["var"] + eps) * p["gamma"] + p["beta"]
    z = wy + xs
    return z.reshape(B, H1, W1, C).transpose(0, 3, 1, 2)


def rlnl_ref(x, p):
    B, C, H, W = x.shape
    H1, W1 = H // 2, W // 2
    out = jnp.zeros_like(x)
    out = out.at[:, :, :H1, :W1].set(_nonlocal_ref_nchw(x[:, :, :H1, :W1], p))
    out = out.at[:, :, H1:, :W1].set(_nonlocal_ref_nchw(x[:, :, H1:, :W1], p))
    out = out.at[:, :, :H1, W1:].set(_nonlocal_ref_nchw(x[:, :, :H1, W1:], p))
    out = out.at[:, :, H1:, W1:].set(_nonlocal_ref_nchw(x[:, :, H1:, W1:], p))
    return out


if __name__ == "__main__":
    B, C, H, W = 2, 64, 16, 16          # RLNL defaults: in_feat=64, inter_feat=32
    key = jax.random.PRNGKey(0)
    kx, kp = jax.random.split(key)
    x = jax.random.normal(kx, (B, C, H, W), jnp.float32)
    params = init_params(kp, in_feat=C, inter_feat=32)

    out = jax.block_until_ready(jax.jit(rlnl_forward)(x, params))
    assert out.shape == x.shape and out.dtype == x.dtype

    # Cross-check the Pallas kernel against a plain-JAX NCHW reference that
    # mirrors the PyTorch forward (now with nonzero BN params so the whole
    # projection/attention/BN path is validated, not just the residual).
    ref = rlnl_ref(x, params)
    max_err = float(jnp.max(jnp.abs(out - ref)))
    assert jnp.allclose(out, ref, atol=1e-4, rtol=1e-4), max_err

    print("KERNEL_OK")
</pallas_src>

<mosaic_0001>
module attributes {stable_mosaic.version = 11 : i64} {
  func.func @_nonlocal_kernel(%arg0: i32, %arg1: memref<4x64x64xf32, #tpu.memory_space<vmem>>, %arg2: memref<64x96xf32, #tpu.memory_space<vmem>>, %arg3: memref<1x96xf32, #tpu.memory_space<vmem>>, %arg4: memref<32x64xf32, #tpu.memory_space<vmem>>, %arg5: memref<1x64xf32, #tpu.memory_space<vmem>>, %arg6: memref<4x64x64xf32, #tpu.memory_space<vmem>>) attributes {dimension_semantics = [#tpu.dimension_semantics<parallel>], iteration_bounds = array<i64: 2>, scalar_prefetch = 0 : i64, scratch_operands = 0 : i64, tpu.core_type = #tpu.core_type<tc>, window_params = [{transform_indices = @transform_0, window_bounds = array<i64: 4, 64, 64>}, {pipeline_mode = #tpu.pipeline_mode<synchronous>, transform_indices = @transform_1, window_bounds = array<i64: 64, 96>}, {pipeline_mode = #tpu.pipeline_mode<synchronous>, transform_indices = @transform_2, window_bounds = array<i64: 1, 96>}, {pipeline_mode = #tpu.pipeline_mode<synchronous>, transform_indices = @transform_3, window_bounds = array<i64: 32, 64>}, {pipeline_mode = #tpu.pipeline_mode<synchronous>, transform_indices = @transform_4, window_bounds = array<i64: 1, 64>}, {transform_indices = @transform_5, window_bounds = array<i64: 4, 64, 64>}]} {
    %c0 = arith.constant 0 : index
    %c0_0 = arith.constant 0 : index
    %c0_1 = arith.constant 0 : index
    %0 = vector.load %arg1[%c0, %c0_0, %c0_1] : memref<4x64x64xf32, #tpu.memory_space<vmem>>, vector<4x64x64xf32>
    %1 = vector.shape_cast %0 : vector<4x64x64xf32> to vector<256x64xf32>
    %c0_2 = arith.constant 0 : index
    %c0_3 = arith.constant 0 : index
    %2 = vector.load %arg2[%c0_2, %c0_3] : memref<64x96xf32, #tpu.memory_space<vmem>>, vector<64x96xf32>
    %cst = arith.constant dense<0.000000e+00> : vector<256x96xf32>
    %3 = tpu.matmul %1, %2, %cst {dimension_numbers = #tpu.dot_dimension_numbers<[1], [0], [0], [1], [0, 0, 1, 1], [], []>} : vector<256x64xf32>, vector<64x96xf32>, vector<256x96xf32> -> vector<256x96xf32>
    %c0_4 = arith.constant 0 : index
    %c0_5 = arith.constant 0 : index
    %4 = vector.load %arg3[%c0_4, %c0_5] : memref<1x96xf32, #tpu.memory_space<vmem>>, vector<1x96xf32>
    %5 = vector.broadcast %4 : vector<1x96xf32> to vector<256x96xf32>
    %6 = arith.addf %3, %5 : vector<256x96xf32>
    %7 = vector.shape_cast %6 : vector<256x96xf32> to vector<4x64x96xf32>
    %8 = vector.extract_strided_slice %7 {offsets = [0, 0, 0], sizes = [4, 64, 32], strides = [1, 1, 1]} : vector<4x64x96xf32> to vector<4x64x32xf32>
    %9 = vector.extract_strided_slice %7 {offsets = [0, 0, 32], sizes = [4, 64, 32], strides = [1, 1, 1]} : vector<4x64x96xf32> to vector<4x64x32xf32>
    %10 = vector.extract_strided_slice %7 {offsets = [0, 0, 64], sizes = [4, 64, 32], strides = [1, 1, 1]} : vector<4x64x96xf32> to vector<4x64x32xf32>
    "tpu.trace_start"() <{level = 10 : i32, message = "gnc,gmc->gnm"}> : () -> ()
    %cst_6 = arith.constant dense<0.000000e+00> : vector<4x64x64xf32>
    %11 = tpu.matmul %9, %10, %cst_6 {dimension_numbers = #tpu.dot_dimension_numbers<[2], [2], [1], [1], [0, 0, 0, 1, 1, 1], [0], [0]>} : vector<4x64x32xf32>, vector<4x64x32xf32>, vector<4x64x64xf32> -> vector<4x64x64xf32>
    "tpu.trace_stop"() : () -> ()
    %cst_7 = arith.constant dense<0xFF800000> : vector<4x64xf32>
    %12 = vector.multi_reduction <maximumf>, %11, %cst_7 [2] : vector<4x64x64xf32> to vector<4x64xf32>
    %13 = vector.shape_cast %12 : vector<4x64xf32> to vector<4x64x1xf32>
    %14 = vector.broadcast %13 : vector<4x64x1xf32> to vector<4x64x64xf32>
    %15 = arith.subf %11, %14 : vector<4x64x64xf32>
    %16 = math.exp %15 : vector<4x64x64xf32>
    %cst_8 = arith.constant dense<0.000000e+00> : vector<4x64xf32>
    %17 = vector.multi_reduction <add>, %16, %cst_8 [2] : vector<4x64x64xf32> to vector<4x64xf32>
    %18 = vector.shape_cast %17 : vector<4x64xf32> to vector<4x64x1xf32>
    "tpu.trace_start"() <{level = 10 : i32, message = "gnm,gmc->gnc"}> : () -> ()
    %cst_9 = arith.constant dense<0.000000e+00> : vector<4x64x32xf32>
    %19 = tpu.matmul %16, %8, %cst_9 {dimension_numbers = #tpu.dot_dimension_numbers<[2], [1], [1], [2], [0, 0, 0, 1, 1, 2], [0], [0]>} : vector<4x64x64xf32>, vector<4x64x32xf32>, vector<4x64x32xf32> -> vector<4x64x32xf32>
    "tpu.trace_stop"() : () -> ()
    %20 = tpu.reciprocal %18 : vector<4x64x1xf32> -> vector<4x64x1xf32>
    %21 = vector.broadcast %20 : vector<4x64x1xf32> to vector<4x64x32xf32>
    %22 = arith.mulf %19, %21 : vector<4x64x32xf32>
    %23 = vector.shape_cast %22 : vector<4x64x32xf32> to vector<256x32xf32>
    %c0_10 = arith.constant 0 : index
    %c0_11 = arith.constant 0 : index
    %24 = vector.load %arg4[%c0_10, %c0_11] : memref<32x64xf32, #tpu.memory_space<vmem>>, vector<32x64xf32>
    %cst_12 = arith.constant dense<0.000000e+00> : vector<256x64xf32>
    %25 = tpu.matmul %23, %24, %cst_12 {dimension_numbers = #tpu.dot_dimension_numbers<[1], [0], [0], [1], [0, 0, 1, 1], [], []>} : vector<256x32xf32>, vector<32x64xf32>, vector<256x64xf32> -> vector<256x64xf32>
    %c0_13 = arith.constant 0 : index
    %c0_14 = arith.constant 0 : index
    %26 = vector.load %arg5[%c0_13, %c0_14] : memref<1x64xf32, #tpu.memory_space<vmem>>, vector<1x64xf32>
    %27 = vector.broadcast %26 : vector<1x64xf32> to vector<256x64xf32>
    %28 = arith.addf %25, %27 : vector<256x64xf32>
    %29 = vector.shape_cast %28 : vector<256x64xf32> to vector<4x64x64xf32>
    %30 = arith.addf %29, %0 : vector<4x64x64xf32>
    %c0_15 = arith.constant 0 : index
    %c0_16 = arith.constant 0 : index
    %c0_17 = arith.constant 0 : index
    %31 = vector.load %arg6[%c0_15, %c0_16, %c0_17] : memref<4x64x64xf32, #tpu.memory_space<vmem>>, vector<4x64x64xf32>
    tpu.vector_store %arg6[%c0_15, %c0_16, %c0_17], %30 {strides = array<i32>} : memref<4x64x64xf32, #tpu.memory_space<vmem>>, vector<4x64x64xf32>,
    return
  }
  func.func @transform_0(%arg0: i32) -> (i32, i32, i32) {
    %c0_i32 = arith.constant 0 : i32
    %c0_i32_0 = arith.constant 0 : i32
    %c0_i32_1 = arith.constant 0 : i32
    return %arg0, %c0_i32, %c0_i32_0 : i32, i32, i32
  }
  func.func @transform_1(%arg0: i32) -> (i32, i32) {
    %c0_i32 = arith.constant 0 : i32
    %c0_i32_0 = arith.constant 0 : i32
    %c0_i32_1 = arith.constant 0 : i32
    return %c0_i32, %c0_i32_0 : i32, i32
  }
  func.func @transform_2(%arg0: i32) -> (i32, i32) {
    %c0_i32 = arith.constant 0 : i32
    %c0_i32_0 = arith.constant 0 : i32
    %c0_i32_1 = arith.constant 0 : i32
    return %c0_i32, %c0_i32_0 : i32, i32
  }
  func.func @transform_3(%arg0: i32) -> (i32, i32) {
    %c0_i32 = arith.constant 0 : i32
    %c0_i32_0 = arith.constant 0 : i32
    %c0_i32_1 = arith.constant 0 : i32
    return %c0_i32, %c0_i32_0 : i32, i32
  }
  func.func @transform_4(%arg0: i32) -> (i32, i32) {
    %c0_i32 = arith.constant 0 : i32
    %c0_i32_0 = arith.constant 0 : i32
    %c0_i32_1 = arith.constant 0 : i32
    return %c0_i32, %c0_i32_0 : i32, i32
  }
  func.func @transform_5(%arg0: i32) -> (i32, i32, i32) {
    %c0_i32 = arith.constant 0 : i32
    %c0_i32_0 = arith.constant 0 : i32
    %c0_i32_1 = arith.constant 0 : i32
    return %arg0, %c0_i32, %c0_i32_0 : i32, i32, i32
  }
}

</mosaic_0001>

<bundles_post_ra>
// kernel: rlnl_forward.1
= control target key start
LH: loop header
LB: loop body
LE: loop exit
PB: predicated region body
PF: predicated region fallthrough
CT: control target
= control target key end

     0   :  { %s3812_s18 = smov 0   ;;  %s4734_s0 = inlined_call_operand.vmem [shape: f32[8,64,64], index: 0, kind: input, shape index: {}, may-alias: {0,5}]   ;;  %s4735_s1 = inlined_call_operand.vmem [shape: f32[64,96], index: 1, kind: input, shape index: {}]   ;;  %s4736_s2 = inlined_call_operand.vmem [shape: f32[1,96], index: 2, kind: input, shape index: {}]   ;;  %s4737_s3 = inlined_call_operand.vmem [shape: f32[32,64], index: 3, kind: input, shape index: {}]   ;;  %s4738_s4 = inlined_call_operand.vmem [shape: f32[1,64], index: 4, kind: input, shape index: {}]   ;;  %s4739_s5 = inlined_call_operand.vmem [shape: f32[8,64,64], index: 5, kind: output, shape index: {}, may-alias: {0,5}]  }
   0x1 LB: > { %s2633_s19 = sadd.s32 4294967295, %s3778_s18   ;;  %p2637_p0 = scmp.ge.s32.totalorder %s3778_s18, 1  ;;  %s3778_s18 = sphi %s3812_s18, %s15_s18  }
   0x2   : > { %p189_p1 = scmp.lt.s32.totalorder %s3778_s18, 3 }
   0x4   : > { %p190_p2 = pnand %p2637_p0, %p189_p1 }
   0x6   : > { %193 = sbr.rel (%p190_p2) target bundleno = 1283 (0x503), region = 40 }
   0xd   : > { %v265_v0 = vld [vmem:[%s4735_s1] sm:$0xff]  ;;  %v266_v1 = vld [vmem:[%s4735_s1 + $0x8] sm:$0xff]  ;;  %v267_v2 = vld [vmem:[%s4735_s1 + $0x10] sm:$0xff]  ;;  %s2638_s26 = sshll.u32 %s2633_s19, 2  ;;  %vm280_vm0 = vcmask 523264   ;;  %s3780_s19 = smov 64  }
   0xe   : > { %v3358_v3 = vpack.c.bf16 %v266_v1, %v265_v0  ;;  %v268_v4 = vld [vmem:[%s4735_s1 + $0x18] sm:$0xff]  ;;  %p220_p3 = scmp.lt.s32.totalorder %s2638_s26, 7  ;;  %v269_v6 = vld [vmem:[%s4735_s1 + $0x20] sm:$0xff]  ;;  %v270_v7 = vld [vmem:[%s4735_s1 + $0x28] sm:$0xff]  ;;  %s3781_s20 = smov 96   ;;  %vm642_vm1 = vcmask 261120  }
   0xf   : > { %v3362_v5 = vpack.c.bf16 %v268_v4, %v267_v2  ;;  %v3366_v8 = vpack.c.bf16 %v270_v7, %v269_v6  ;;  %v271_v9 = vld [vmem:[%s4735_s1 + $0x30] sm:$0xff]  ;;  %v272_v10 = vld [vmem:[%s4735_s1 + $0x38] sm:$0xff]  ;;  %v3993_v44 = vld [vmem:[%s4736_s2] ss:$0 sm:$0xff] }
  0x10   : > { %3359 = vmatprep.subr.bf16.mxu0 %v3358_v3  ;;  %s4788_s26 = smov (!%p220_p3, %s2638_s26), 7  ;;  %v3370_v12 = vpack.c.bf16 %v272_v10, %v271_v9  ;;  %vm4134_vm2 = vmpackc.low %vm642_vm1, %vm642_vm1 }
  0x11   : > { %3361 = vmatpush3.bf16.msra.mxu0 %v3358_v3  ;;  %s2808_s8 = sshll.u32 %s4788_s26, 6 }
  0x12   : > { %3363 = vmatprep.subr.bf16.mxu0 %v3362_v5  ;;  %s3852_s15 = scalar_lea.vmem %s4734_s0, %s2808_s8  ;;  %s4602_s10 = scalar_lea.vmem %s4739_s5, %s2808_s8 }
  0x13   : > { %v233_v11 = vld [vmem:[%s3852_s15] sm:$0xff]  ;;  %v234_v13 = vld [vmem:[%s3852_s15 + $0x8] sm:$0xff]  ;;  %v235_v14 = vld [vmem:[%s3852_s15 + $0x10] sm:$0xff] }
  0x14   : > { %3030 = vmatprep.mubr.msk.f32.mxu0 %vm280_vm0, %v233_v11  ;;  %v236_v15 = vld [vmem:[%s3852_s15 + $0x18] sm:$0xff]  ;;  %v237_v16 = vld [vmem:[%s3852_s15 + $0x20] sm:$0xff]  ;;  %v238_v17 = vld [vmem:[%s3852_s15 + $0x28] sm:$0xff] }
  0x15   : > { %3365 = vmatpush3.bf16.msra.mxu0 %v3362_v5  ;;  %v239_v18 = vld [vmem:[%s3852_s15 + $0x30] sm:$0xff]  ;;  %v240_v19 = vld [vmem:[%s3852_s15 + $0x38] sm:$0xff]  ;;  %v3870_v20 = vld [vmem:[%s3852_s15 + $0x40] sm:$0xff] }
  0x16   : > { %3367 = vmatprep.subr.bf16.mxu0 %v3366_v8  ;;  %v3876_v21 = vld [vmem:[%s3852_s15 + $0x48] sm:$0xff]  ;;  %v3879_v22 = vld [vmem:[%s3852_s15 + $0x50] sm:$0xff]  ;;  %v3886_v23 = vld [vmem:[%s3852_s15 + $0x58] sm:$0xff] }
  0x17   : > { %v3889_v24 = vld [vmem:[%s3852_s15 + $0x60] sm:$0xff]  ;;  %v3896_v25 = vld [vmem:[%s3852_s15 + $0x68] sm:$0xff]  ;;  %v3899_v26 = vld [vmem:[%s3852_s15 + $0x70] sm:$0xff] }
  0x18   : > { %v3906_v27 = vld [vmem:[%s3852_s15 + $0x78] sm:$0xff]  ;;  %v3909_v28 = vld [vmem:[%s3852_s15 + $0x80] sm:$0xff]  ;;  %v3916_v29 = vld [vmem:[%s3852_s15 + $0x88] sm:$0xff] }
  0x19   : > { %3369 = vmatpush3.bf16.msra.mxu0 %v3366_v8  ;;  %4755 = vst [vmem:[#allocation2_spill] sm:$0xff] %v3909_v28  ;;  %v3919_v30 = vld [vmem:[%s3852_s15 + $0x90] sm:$0xff]  ;;  %v3926_v31 = vld [vmem:[%s3852_s15 + $0x98] sm:$0xff]  ;;  %v3929_v32 = vld [vmem:[%s3852_s15 + $0xa0] sm:$0xff] }
  0x1a   : > { %3371 = vmatprep.subr.bf16.mxu0 %v3370_v12  ;;  %4756 = vst [vmem:[#allocation3_spill] sm:$0xff] %v3919_v30  ;;  %4757 = vst [vmem:[#allocation4_spill] sm:$0xff] %v3926_v31  ;;  %v3936_v33 = vld [vmem:[%s3852_s15 + $0xa8] sm:$0xff]  ;;  %v3939_v34 = vld [vmem:[%s3852_s15 + $0xb0] sm:$0xff] }
  0x1b   : > { %4758 = vst [vmem:[#allocation5_spill] sm:$0xff] %v3929_v32  ;;  %4759 = vst [vmem:[#allocation6_spill] sm:$0xff] %v3936_v33  ;;  %v3946_v35 = vld [vmem:[%s3852_s15 + $0xb8] sm:$0xff]  ;;  %v3949_v36 = vld [vmem:[%s3852_s15 + $0xc0] sm:$0xff] }
  0x1c   : > { %4760 = vst [vmem:[#allocation7_spill] sm:$0xff] %v3939_v34  ;;  %4761 = vst [vmem:[#allocation8_spill] sm:$0xff] %v3946_v35  ;;  %v3956_v37 = vld [vmem:[%s3852_s15 + $0xc8] sm:$0xff]  ;;  %v3959_v38 = vld [vmem:[%s3852_s15 + $0xd0] sm:$0xff] }
  0x1d   : > { %3373 = vmatpush3.bf16.msra.mxu0 %v3370_v12  ;;  %4762 = vst [vmem:[#allocation9_spill] sm:$0xff] %v3949_v36  ;;  %4763 = vst [vmem:[#allocation10_spill] sm:$0xff] %v3956_v37  ;;  %v3966_v39 = vld [vmem:[%s3852_s15 + $0xd8] sm:$0xff]  ;;  %v3969_v40 = vld [vmem:[%s3852_s15 + $0xe0] sm:$0xff] }
  0x1e   : > { %4764 = vst [vmem:[#allocation11_spill] sm:$0xff] %v3959_v38  ;;  %4765 = vst [vmem:[#allocation12_spill] sm:$0xff] %v3966_v39  ;;  %v3976_v41 = vld [vmem:[%s3852_s15 + $0xe8] sm:$0xff]  ;;  %v3979_v42 = vld [vmem:[%s3852_s15 + $0xf0] sm:$0xff] }
  0x1f   : > { %4766 = vst [vmem:[#allocation13_spill] sm:$0xff] %v3969_v40  ;;  %4767 = vst [vmem:[#allocation14_spill] sm:$0xff] %v3976_v41  ;;  %v3986_v43 = vld [vmem:[%s3852_s15 + $0xf8] sm:$0xff] }
  0x20   : > { %3031 = vmatmul.mubr.msk.f32.vlgmr.msra.gmra.mrb[0].mxu0 %vm280_vm0, %v234_v13  ;;  %4768 = vst [vmem:[#allocation15_spill] sm:$0xff] %v3979_v42  ;;  %4769 = vst [vmem:[#allocation16_spill] sm:$0xff] %v3986_v43 }
  0x21   : > { %3033 = vmatprep.mubr.msk.f32.mxu0 %vm280_vm0, %v235_v14 }
  0x24   : > { %3034 = vmatmul.mubr.msk.f32.gmra.mrb[2].mxu0 %vm280_vm0, %v236_v15 }
  0x25   : > { %3036 = vmatprep.mubr.msk.f32.mxu0 %vm280_vm0, %v237_v16 }
  0x28   : > { %3037 = vmatmul.mubr.msk.f32.gmra.mrb[4].mxu0 %vm280_vm0, %v238_v17 }
  0x29   : > { %3039 = vmatprep.mubr.msk.f32.mxu0 %vm280_vm0, %v239_v18 }
  0x2c   : > { %3040 = vmatmul.mubr.msk.f32.gmra.mrb[6].mxu0 %vm280_vm0, %v240_v19 }
  0x2d   : > { %3042 = vmatprep.mubr.msk.f32.mxu0 %vm280_vm0, %v3870_v20 }
  0x30   : > { %3043 = vmatmul.mubr.msk.f32.gmra.mrb[8].mxu0 %vm280_vm0, %v3876_v21 }
  0x31   : > { %3045 = vmatprep.mubr.msk.f32.mxu0 %vm280_vm0, %v3879_v22 }
  0x34   : > { %3046 = vmatmul.mubr.msk.f32.gmra.mrb[10].mxu0 %vm280_vm0, %v3886_v23 }
  0x35   : > { %3048 = vmatprep.mubr.msk.f32.mxu0 %vm280_vm0, %v3889_v24 }
  0x38   : > { %3049 = vmatmul.mubr.msk.f32.gmra.mrb[12].mxu0 %vm280_vm0, %v3896_v25 }
  0x39   : > { %3051 = vmatprep.mubr.msk.f32.mxu0 %vm280_vm0, %v3899_v26 }
  0x3c   : > { %3052 = vmatmul.mubr.msk.f32.gmra.mrb[14].mxu0 %vm280_vm0, %v3906_v27 }
  0x3d   : > { %3054 = vmatprep.mubr.msk.f32.mxu0 %vm280_vm0, %v3909_v28 }
  0x40   : > { %3055 = vmatmul.mubr.msk.f32.gmra.mrb[16].mxu0 %vm280_vm0, %v3916_v29 }
  0x41   : > { %3057 = vmatprep.mubr.msk.f32.mxu0 %vm280_vm0, %v3919_v30 }
  0x44   : > { %3058 = vmatmul.mubr.msk.f32.gmra.mrb[18].mxu0 %vm280_vm0, %v3926_v31 }
  0x45   : > { %3060 = vmatprep.mubr.msk.f32.mxu0 %vm280_vm0, %v3929_v32 }
  0x48   : > { %3061 = vmatmul.mubr.msk.f32.gmra.mrb[20].mxu0 %vm280_vm0, %v3936_v33 }
  0x49   : > { %3063 = vmatprep.mubr.msk.f32.mxu0 %vm280_vm0, %v3939_v34 }
  0x4c   : > { %3064 = vmatmul.mubr.msk.f32.gmra.mrb[22].mxu0 %vm280_vm0, %v3946_v35 }
  0x4d   : > { %3066 = vmatprep.mubr.msk.f32.mxu0 %vm280_vm0, %v3949_v36 }
  0x50   : > { %3067 = vmatmul.mubr.msk.f32.gmra.mrb[24].mxu0 %vm280_vm0, %v3956_v37 }
  0x51   : > { %3069 = vmatprep.mubr.msk.f32.mxu0 %vm280_vm0, %v3959_v38 }
  0x54   : > { %3070 = vmatmul.mubr.msk.f32.gmra.mrb[26].mxu0 %vm280_vm0, %v3966_v39 }
  0x55   : > { %3072 = vmatprep.mubr.msk.f32.mxu0 %vm280_vm0, %v3969_v40 }
  0x58   : > { %3073 = vmatmul.mubr.msk.f32.gmra.mrb[28].mxu0 %vm280_vm0, %v3976_v41 }
  0x59   : > { %3075 = vmatprep.mubr.msk.f32.mxu0 %vm280_vm0, %v3979_v42 }
  0x5c   : > { %3076 = vmatmul.mubr.msk.f32.gmra.mrb[30].mxu0 %vm280_vm0, %v3986_v43 }
  0xf3   : > { %v3032_v45 = vpop.f32.mrb[0].mxu0 }
  0xf4   : > { %v449_v46 = vadd.f32 %v3032_v45, %v3993_v44  ;;  %v443_v47 = vpop.f32.mrb[1].mxu0 }
  0xf5   : > { %v444_v48 = vadd.f32 %v3993_v44, %v443_v47 }
  0xf7   : > { %v3035_v49 = vpop.f32.mrb[2].mxu0  ;;  %v3556_v50 = vpack.i.bf16 %v449_v46, %v444_v48  ;;  %v3997_v51 = vpack.c.bf16 %v449_v46, %v444_v48 }
  0xf8   : > { %v459_v52 = vadd.f32 %v3035_v49, %v3993_v44  ;;  %v453_v53 = vpop.f32.mrb[3].mxu0 }
  0xf9   : > { %v454_v54 = vadd.f32 %v3993_v44, %v453_v53  ;;  %3557 = vrot.lane.b32.xlu0 %v3556_v50, %s3780_s19 }
  0xfb   : > { %v3038_v55 = vpop.f32.mrb[4].mxu0  ;;  %v3561_v56 = vpack.i.bf16 %v459_v52, %v454_v54  ;;  %v4002_v57 = vpack.c.bf16 %v459_v52, %v454_v54 }
  0xfc   : > { %v469_v58 = vadd.f32 %v3038_v55, %v3993_v44  ;;  %v463_v59 = vpop.f32.mrb[5].mxu0 }
  0xfd   : > { %v464_v60 = vadd.f32 %v3993_v44, %v463_v59  ;;  %3562 = vrot.lane.b32.xlu0 %v3561_v56, %s3780_s19 }
  0xff   : > { %v3041_v61 = vpop.f32.mrb[6].mxu0  ;;  %v3566_v62 = vpack.i.bf16 %v469_v58, %v464_v60  ;;  %v4007_v63 = vpack.c.bf16 %v469_v58, %v464_v60 }
 0x100   : > { %v479_v0 = vadd.f32 %v3041_v61, %v3993_v44  ;;  %v473_v1 = vpop.f32.mrb[7].mxu0 }
 0x101   : > { %v474_v2 = vadd.f32 %v3993_v44, %v473_v1  ;;  %3567 = vrot.lane.b32.xlu1 %v3566_v62, %s3780_s19  ;;  %612 = vrot.lane.b32.xlu0 %v449_v46, %s3781_s20 }
 0x103   : > { %v3044_v3 = vpop.f32.mrb[8].mxu0  ;;  %v3571_v4 = vpack.i.bf16 %v479_v0, %v474_v2  ;;  %v4013_v5 = vpack.c.bf16 %v479_v0, %v474_v2 }
 0x104   : > { %v489_v6 = vadd.f32 %v3044_v3, %v3993_v44  ;;  %v483_v7 = vpop.f32.mrb[9].mxu0 }
 0x105   : > { %v484_v8 = vadd.f32 %v3993_v44, %v483_v7  ;;  %3572 = vrot.lane.b32.xlu1 %v3571_v4, %s3780_s19 }
 0x107   : > { %v3576_v9 = vpack.i.bf16 %v489_v6, %v484_v8  ;;  %v3047_v10 = vpop.f32.mrb[10].mxu0  ;;  %v4018_v11 = vpack.c.bf16 %v489_v6, %v484_v8 }
 0x108   : > { %v4021_v12 = vadd.f32 %v3047_v10, %v3993_v44  ;;  %v493_v13 = vpop.f32.mrb[11].mxu0 }
 0x109   : > { %610 = vrot.lane.b32.xlu1 %v444_v48, %s3781_s20  ;;  %3577 = vrot.lane.b32.xlu0 %v3576_v9, %s3780_s19  ;;  %v494_v14 = vadd.f32 %v3993_v44, %v493_v13 }
 0x10b   : > { %v3050_v15 = vpop.f32.mrb[12].mxu0  ;;  %v3581_v16 = vpack.i.bf16 %v4021_v12, %v494_v14  ;;  %v4028_v17 = vpack.c.bf16 %v4021_v12, %v494_v14 }
 0x10c   : > { %v4031_v18 = vadd.f32 %v3050_v15, %v3993_v44  ;;  %v503_v19 = vpop.f32.mrb[13].mxu0 }
 0x10d   : > { %616 = vrot.lane.b32.xlu1 %v459_v52, %s3781_s20  ;;  %614 = vrot.lane.b32.xlu0 %v454_v54, %s3781_s20  ;;  %v504_v45 = vadd.f32 %v3993_v44, %v503_v19 }
 0x10f   : > { %v3053_v46 = vpop.f32.mrb[14].mxu0  ;;  %v3586_v47 = vpack.i.bf16 %v4031_v18, %v504_v45  ;;  %v4038_v48 = vpack.c.bf16 %v4031_v18, %v504_v45 }
 0x110   : > { %v4041_v49 = vadd.f32 %v3053_v46, %v3993_v44  ;;  %v513_v50 = vpop.f32.mrb[15].mxu0 }
 0x111   : > { %620 = vrot.lane.b32.xlu1 %v469_v58, %s3781_s20  ;;  %618 = vrot.lane.b32.xlu0 %v464_v60, %s3781_s20  ;;  %v4046_v52 = vadd.f32 %v3993_v44, %v513_v50 }
 0x113   : > { %v3056_v53 = vpop.f32.mrb[16].mxu0  ;;  %v3591_v54 = vpack.i.bf16 %v4041_v49, %v4046_v52  ;;  %v4052_v55 = vpack.c.bf16 %v4041_v49, %v4046_v52 }
 0x114   : > { %v4055_v56 = vadd.f32 %v3056_v53, %v3993_v44  ;;  %v523_v59 = vpop.f32.mrb[17].mxu0 }
 0x115   : > { %3582 = vrot.lane.b32.xlu1 %v3581_v16, %s3780_s19  ;;  %622 = vrot.lane.b32.xlu0 %v474_v2, %s3781_s20  ;;  %v524_v58 = vadd.f32 %v3993_v44, %v523_v59 }
 0x117   : > { %v3596_v60 = vpack.i.bf16 %v4055_v56, %v524_v58  ;;  %v3059_v61 = vpop.f32.mrb[18].mxu0  ;;  %v4062_v62 = vpack.c.bf16 %v4055_v56, %v524_v58 }
 0x118   : > { %v539_v1 = vadd.f32 %v3059_v61, %v3993_v44  ;;  %v533_v3 = vpop.f32.mrb[19].mxu0 }
 0x119   : > { %624 = vrot.lane.b32.xlu1 %v479_v0, %s3781_s20  ;;  %3587 = vrot.lane.b32.xlu0 %v3586_v47, %s3780_s19  ;;  %v534_v4 = vadd.f32 %v3993_v44, %v533_v3 }
 0x11b   : > { %v3062_v7 = vpop.f32.mrb[20].mxu0  ;;  %v3601_v9 = vpack.i.bf16 %v539_v1, %v534_v4  ;;  %v4068_v2 = vpack.c.bf16 %v539_v1, %v534_v4 }
 0x11c   : > { %v549_v10 = vadd.f32 %v3062_v7, %v3993_v44  ;;  %v543_v13 = vpop.f32.mrb[21].mxu0 }
 0x11d   : > { %3597 = vrot.lane.b32.xlu1 %v3596_v60, %s3780_s19  ;;  %788 = vrot.lane.b32.xlu0 %v484_v8, %s3781_s20  ;;  %v544_v15 = vadd.f32 %v3993_v44, %v543_v13 }
 0x11f   : > { %v3065_v16 = vpop.f32.mrb[22].mxu0  ;;  %v3606_v19 = vpack.i.bf16 %v549_v10, %v544_v15  ;;  %v4074_v0 = vpack.c.bf16 %v549_v10, %v544_v15 }
 0x120   : > { %v559_v46 = vadd.f32 %v3065_v16, %v3993_v44  ;;  %v553_v47 = vpop.f32.mrb[23].mxu0 }
 0x121   : > { %790 = vrot.lane.b32.xlu1 %v489_v6, %s3781_s20  ;;  %3592 = vrot.lane.b32.xlu0 %v3591_v54, %s3780_s19  ;;  %v554_v50 = vadd.f32 %v3993_v44, %v553_v47 }
 0x123   : > { %v3068_v53 = vpop.f32.mrb[24].mxu0  ;;  %v3611_v59 = vpack.i.bf16 %v559_v46, %v554_v50  ;;  %v4080_v60 = vpack.c.bf16 %v559_v46, %v554_v50 }
 0x124   : > { %v569_v8 = vadd.f32 %v3068_v53, %v3993_v44  ;;  %v563_v61 = vpop.f32.mrb[25].mxu0 }
 0x125   : > { %3602 = vrot.lane.b32.xlu1 %v3601_v9, %s3780_s19  ;;  %792 = vrot.lane.b32.xlu0 %v494_v14, %s3781_s20  ;;  %v564_v3 = vadd.f32 %v3993_v44, %v563_v61 }
 0x127   : > { %v3616_v7 = vpack.i.bf16 %v569_v8, %v564_v3  ;;  %v3071_v13 = vpop.f32.mrb[26].mxu0  ;;  %v4086_v6 = vpack.c.bf16 %v569_v8, %v564_v3 }
 0x128   : > { %v579_v54 = vadd.f32 %v3071_v13, %v3993_v44  ;;  %v573_v16 = vpop.f32.mrb[27].mxu0 }
 0x129   : > { %794 = vrot.lane.b32.xlu1 %v4021_v12, %s3781_s20  ;;  %3607 = vrot.lane.b32.xlu0 %v3606_v19, %s3780_s19  ;;  %v574_v47 = vadd.f32 %v3993_v44, %v573_v16 }
 0x12b   : > { %v3074_v53 = vpop.f32.mrb[28].mxu0  ;;  %v3621_v9 = vpack.i.bf16 %v579_v54, %v574_v47  ;;  %v4093_v42 = vpack.c.bf16 %v579_v54, %v574_v47 }
 0x12c   : > { %v589_v14 = vadd.f32 %v3074_v53, %v3993_v44  ;;  %v583_v61 = vpop.f32.mrb[29].mxu0 }
 0x12d   : > { %3617 = vrot.lane.b32.xlu1 %v3616_v7, %s3780_s19  ;;  %796 = vrot.lane.b32.xlu0 %v504_v45, %s3781_s20  ;;  %v584_v13 = vadd.f32 %v3993_v44, %v583_v61 }
 0x12f   : > { %v3626_v43 = vpack.i.bf16 %v589_v14, %v584_v13  ;;  %v3077_v40 = vpop.f32.mrb[30].mxu0  ;;  %v4099_v12 = vpack.c.bf16 %v589_v14, %v584_v13 }
 0x130   : > { %v599_v19 = vadd.f32 %v3077_v40, %v3993_v44  ;;  %v593_v16 = vpop.f32.mrb[31].mxu0 }
 0x131   : > { %798 = vrot.lane.b32.xlu1 %v4031_v18, %s3781_s20  ;;  %3612 = vrot.lane.b32.xlu0 %v3611_v59, %s3780_s19  ;;  %v594_v53 = vadd.f32 %v3993_v44, %v593_v16 }
 0x133   : > { %v3631_v41 = vpack.i.bf16 %v599_v19, %v594_v53  ;;  %v4106_v7 = vpack.c.bf16 %v599_v19, %v594_v53 }
 0x135   : > { %3622 = vrot.lane.b32.xlu1 %v3621_v9, %s3780_s19  ;;  %800 = vrot.lane.b32.xlu0 %v4046_v52, %s3781_s20 }
 0x139   : > { %802 = vrot.lane.b32.xlu1 %v4041_v49, %s3781_s20  ;;  %3627 = vrot.lane.b32.xlu0 %v3626_v43, %s3780_s19 }
 0x13d   : > { %965 = vrot.lane.b32.xlu1 %v524_v58, %s3781_s20  ;;  %967 = vrot.lane.b32.xlu0 %v4055_v56, %s3781_s20 }
 0x141   : > { %969 = vrot.lane.b32.xlu1 %v534_v4, %s3781_s20  ;;  %971 = vrot.lane.b32.xlu0 %v539_v1, %s3781_s20 }
 0x145   : > { %3632 = vrot.lane.b32.xlu1 %v3631_v41, %s3780_s19  ;;  %973 = vrot.lane.b32.xlu0 %v544_v15, %s3781_s20 }
 0x149   : > { %975 = vrot.lane.b32.xlu1 %v549_v10, %s3781_s20  ;;  %977 = vrot.lane.b32.xlu0 %v554_v50, %s3781_s20 }
 0x14d   : > { %979 = vrot.lane.b32.xlu1 %v559_v46, %s3781_s20  ;;  %1142 = vrot.lane.b32.xlu0 %v564_v3, %s3781_s20 }
 0x151   : > { %1144 = vrot.lane.b32.xlu1 %v569_v8, %s3781_s20  ;;  %1146 = vrot.lane.b32.xlu0 %v574_v47, %s3781_s20 }
 0x155   : > { %1148 = vrot.lane.b32.xlu1 %v579_v54, %s3781_s20  ;;  %1150 = vrot.lane.b32.xlu0 %v584_v13, %s3781_s20 }
 0x159   : > { %1152 = vrot.lane.b32.xlu1 %v589_v14, %s3781_s20  ;;  %1154 = vrot.lane.b32.xlu0 %v594_v53, %s3781_s20 }
 0x15d   : > { %1156 = vrot.lane.b32.xlu1 %v599_v19, %s3781_s20 }
 0x16b   : > { %v3558_v40 = vpop.permute.xlu0 %3557 }
 0x16c   : > { %v3560_v41 = vunpack.i.h.bf16 %v3558_v40  ;;  %v3559_v43 = vunpack.i.l.bf16 %v3558_v40 }
 0x16e   : > { %v3374_v18 = vpack.c.bf16 %v3560_v41, %v3559_v43 }
 0x16f   : > { %v3563_v45 = vpop.permute.xlu0 %3562 }
 0x170   : > { %v3565_v49 = vunpack.i.h.bf16 %v3563_v45  ;;  %v3564_v52 = vunpack.i.l.bf16 %v3563_v45  ;;  %3376 = vmatprep.subr.msk.bf16.mxu1 %vm4134_vm2, %v3374_v18 }
 0x171   : > { %3379 = vmatpush3.bf16.xpose.msk.msra.mxu1 %vm4134_vm2, %v3374_v18 }
 0x172   : > { %v3380_v56 = vpack.c.bf16 %v3565_v49, %v3564_v52 }
 0x173   : > { %v3568_v58 = vpop.permute.xlu1 %3567  ;;  %v613_v15 = vpop.permute.xlu0 %612 }
 0x174   : > { %v3570_v1 = vunpack.i.h.bf16 %v3568_v58  ;;  %v3569_v4 = vunpack.i.l.bf16 %v3568_v58  ;;  %3382 = vmatprep.subr.msk.bf16.mxu1 %vm4134_vm2, %v3380_v56 }
 0x176   : > { %v3386_v10 = vpack.c.bf16 %v3570_v1, %v3569_v4 }
 0x177   : > { %v3573_v46 = vpop.permute.xlu1 %3572 }
 0x178   : > { %v3575_v50 = vunpack.i.h.bf16 %v3573_v46  ;;  %v3574_v59 = vunpack.i.l.bf16 %v3573_v46 }
 0x179   : > { %3385 = vmatpush3.bf16.xpose.msk.msra.mxu1 %vm4134_vm2, %v3380_v56 }
 0x17a   : > { %3388 = vmatprep.subr.msk.bf16.mxu1 %vm4134_vm2, %v3386_v10  ;;  %v3392_v54 = vpack.c.bf16 %v3575_v50, %v3574_v59 }
 0x17b   : > { %v611_v8 = vpop.permute.xlu1 %610  ;;  %v3578_v3 = vpop.permute.xlu0 %3577 }
 0x17c   : > { %3094 = vmatprep.mubr.msk.f32.mxu1 %vm642_vm1, %v611_v8  ;;  %v3580_v14 = vunpack.i.h.bf16 %v3578_v3  ;;  %v3579_v61 = vunpack.i.l.bf16 %v3578_v3 }
 0x17e   : > { %v3398_v16 = vpack.c.bf16 %v3580_v14, %v3579_v61 }
 0x17f   : > { %v617_v47 = vpop.permute.xlu1 %616  ;;  %v615_v9 = vpop.permute.xlu0 %614 }
 0x181   : > { %3391 = vmatpush3.bf16.xpose.msk.msra.mxu1 %vm4134_vm2, %v3386_v10 }
 0x182   : > { %3394 = vmatprep.subr.msk.bf16.mxu1 %vm4134_vm2, %v3392_v54 }
 0x183   : > { %v621_v13 = vpop.permute.xlu1 %620  ;;  %v619_v19 = vpop.permute.xlu0 %618 }
 0x187   : > { %v3583_v53 = vpop.permute.xlu1 %3582  ;;  %v623_v40 = vpop.permute.xlu0 %622 }
 0x188   : > { %v3585_v41 = vunpack.i.h.bf16 %v3583_v53  ;;  %v3584_v43 = vunpack.i.l.bf16 %v3583_v53 }
 0x189   : > { %3397 = vmatpush3.bf16.xpose.msk.msra.mxu1 %vm4134_vm2, %v3392_v54 }
 0x18a   : > { %3400 = vmatprep.subr.msk.bf16.mxu1 %vm4134_vm2, %v3398_v16  ;;  %v3404_v49 = vpack.c.bf16 %v3585_v41, %v3584_v43 }
 0x18b   : > { %v625_v18 = vpop.permute.xlu1 %624  ;;  %v3588_v45 = vpop.permute.xlu0 %3587 }
 0x18c   : > { %v3590_v50 = vunpack.i.h.bf16 %v3588_v45  ;;  %v3589_v59 = vunpack.i.l.bf16 %v3588_v45 }
 0x18e   : > { %v3410_v3 = vpack.c.bf16 %v3590_v50, %v3589_v59 }
 0x18f   : > { %v3598_v52 = vpop.permute.xlu1 %3597  ;;  %v789_v56 = vpop.permute.xlu0 %788 }
 0x190   : > { %v3600_v58 = vunpack.i.h.bf16 %v3598_v52  ;;  %v3599_v1 = vunpack.i.l.bf16 %v3598_v52  ;;  %3095 = vmatmul.mubr.msk.f32.vlgmr.msra.gmra.mrb[0].mxu1 %vm642_vm1, %v613_v15 }
 0x191   : > { %3097 = vmatprep.mubr.msk.f32.mxu1 %vm642_vm1, %v615_v9  ;;  %3403 = vmatpush3.bf16.xpose.msk.msra.mxu1 %vm4134_vm2, %v3398_v16 }
 0x192   : > { %v3422_v4 = vpack.c.bf16 %v3600_v58, %v3599_v1  ;;  %3406 = vmatprep.subr.msk.bf16.mxu1 %vm4134_vm2, %v3404_v49 }
 0x193   : > { %v791_v10 = vpop.permute.xlu1 %790  ;;  %v3593_v46 = vpop.permute.xlu0 %3592 }
 0x194   : > { %3098 = vmatmul.mubr.msk.f32.gmra.mrb[2].mxu1 %vm642_vm1, %v617_v47  ;;  %3424 = vmatprep.subr.msk.bf16.mxu0 %vm4134_vm2, %v3422_v4  ;;  %v3594_v16 = vunpack.i.l.bf16 %v3593_v46 }
 0x195   : > { %3100 = vmatprep.mubr.msk.f32.mxu1 %vm642_vm1, %v619_v19  ;;  %3427 = vmatpush3.bf16.xpose.msk.msra.mxu0 %vm4134_vm2, %v3422_v4  ;;  %v3595_v19 = vunpack.i.h.bf16 %v3593_v46 }
 0x197   : > { %v3603_v15 = vpop.permute.xlu1 %3602  ;;  %v793_v8 = vpop.permute.xlu0 %792  ;;  %v3416_v45 = vpack.c.bf16 %v3595_v19, %v3594_v16 }
 0x198   : > { %v3605_v54 = vunpack.i.h.bf16 %v3603_v15  ;;  %v3604_v9 = vunpack.i.l.bf16 %v3603_v15  ;;  %3101 = vmatmul.mubr.msk.f32.gmra.mrb[4].mxu1 %vm642_vm1, %v621_v13 }
 0x199   : > { %3103 = vmatprep.mubr.msk.f32.mxu1 %vm642_vm1, %v623_v40  ;;  %3409 = vmatpush3.bf16.xpose.msk.msra.mxu1 %vm4134_vm2, %v3404_v49 }
 0x19a   : > { %v3428_v47 = vpack.c.bf16 %v3605_v54, %v3604_v9  ;;  %3412 = vmatprep.subr.msk.bf16.mxu1 %vm4134_vm2, %v3410_v3 }
 0x19b   : > { %v795_v14 = vpop.permute.xlu1 %794  ;;  %v3608_v61 = vpop.permute.xlu0 %3607 }
 0x19c   : > { %v3610_v53 = vunpack.i.h.bf16 %v3608_v61  ;;  %v3609_v41 = vunpack.i.l.bf16 %v3608_v61  ;;  %3104 = vmatmul.mubr.msk.f32.gmra.mrb[6].mxu1 %vm642_vm1, %v625_v18  ;;  %3430 = vmatprep.subr.msk.bf16.mxu0 %vm4134_vm2, %v3428_v47 }
 0x19d   : > { %3122 = vmatprep.mubr.msk.f32.mxu1 %vm642_vm1, %v789_v56  ;;  %3433 = vmatpush3.bf16.xpose.msk.msra.mxu0 %vm4134_vm2, %v3428_v47 }
 0x19e   : > { %v3434_v13 = vpack.c.bf16 %v3610_v53, %v3609_v41 }
 0x19f   : > { %v3618_v40 = vpop.permute.xlu1 %3617  ;;  %v797_v43 = vpop.permute.xlu0 %796 }
 0x1a0   : > { %3436 = vmatprep.subr.msk.bf16.mxu0 %vm4134_vm2, %v3434_v13  ;;  %v3620_v49 = vunpack.i.h.bf16 %v3618_v40  ;;  %v3619_v18 = vunpack.i.l.bf16 %v3618_v40 }
 0x1a1   : > { %3415 = vmatpush3.bf16.xpose.msk.msra.mxu1 %vm4134_vm2, %v3410_v3 }
 0x1a2   : > { %3418 = vmatprep.subr.msk.bf16.mxu1 %vm4134_vm2, %v3416_v45  ;;  %v3446_v4 = vpack.c.bf16 %v3620_v49, %v3619_v18 }
 0x1a3   : > { %v799_v52 = vpop.permute.xlu1 %798  ;;  %v3613_v56 = vpop.permute.xlu0 %3612 }
 0x1a4   : > { %v3615_v58 = vunpack.i.h.bf16 %v3613_v56  ;;  %v3614_v1 = vunpack.i.l.bf16 %v3613_v56 }
 0x1a5   : > { %3439 = vmatpush3.bf16.xpose.msk.msra.mxu0 %vm4134_vm2, %v3434_v13 }
 0x1a6   : > { %v3440_v46 = vpack.c.bf16 %v3615_v58, %v3614_v1 }
 0x1a7   : > { %v3623_v50 = vpop.permute.xlu1 %3622  ;;  %v801_v59 = vpop.permute.xlu0 %800 }
 0x1a8   : > { %3442 = vmatprep.subr.msk.bf16.mxu0 %vm4134_vm2, %v3440_v46  ;;  %v3625_v15 = vunpack.i.h.bf16 %v3623_v50  ;;  %v3624_v3 = vunpack.i.l.bf16 %v3623_v50 }
 0x1a9   : > { %3421 = vmatpush3.bf16.xpose.msk.msra.mxu1 %vm4134_vm2, %v3416_v45 }
 0x1aa   : > { %3448 = vmatprep.subr.msk.bf16.mxu1 %vm4134_vm2, %v3446_v4  ;;  %v3452_v47 = vpack.c.bf16 %v3625_v15, %v3624_v3 }
 0x1ab   : > { %v803_v54 = vpop.permute.xlu1 %802  ;;  %v3628_v9 = vpop.permute.xlu0 %3627 }
 0x1ac   : > { %v3630_v16 = vunpack.i.h.bf16 %v3628_v9  ;;  %v3629_v53 = vunpack.i.l.bf16 %v3628_v9 }
 0x1ad   : > { %3445 = vmatpush3.bf16.xpose.msk.msra.mxu0 %vm4134_vm2, %v3440_v46 }
 0x1ae   : > { %3471 = vmatprep.subr.bf16.mxu0 %v3997_v51 }
 0x1af   : > { %v966_v61 = vpop.permute.xlu1 %965  ;;  %v968_v19 = vpop.permute.xlu0 %967 }
 0x1b0   : > { %3123 = vmatmul.mubr.msk.f32.vlgmr.msra.gmra.mrb[8].mxu1 %vm642_vm1, %v791_v10  ;;  %3150 = vmatprep.mubr.msk.f32.mxu0 %vm642_vm1, %v966_v61  ;;  %v3458_v10 = vpack.c.bf16 %v3630_v16, %v3629_v53 }
 0x1b1   : > { %3125 = vmatprep.mubr.msk.f32.mxu1 %vm642_vm1, %v793_v8  ;;  %3451 = vmatpush3.bf16.xpose.msk.msra.mxu1 %vm4134_vm2, %v3446_v4 }
 0x1b2   : > { %3454 = vmatprep.subr.msk.bf16.mxu1 %vm4134_vm2, %v3452_v47 }
 0x1b3   : > { %v970_v41 = vpop.permute.xlu1 %969  ;;  %v972_v13 = vpop.permute.xlu0 %971 }
 0x1b4   : > { %3126 = vmatmul.mubr.msk.f32.gmra.mrb[10].mxu1 %vm642_vm1, %v795_v14  ;;  %3151 = vmatmul.mubr.msk.f32.vlgmr.msra.gmra.mrb[32].mxu0 %vm642_vm1, %v968_v19 }
 0x1b5   : > { %3128 = vmatprep.mubr.msk.f32.mxu1 %vm642_vm1, %v797_v43  ;;  %3153 = vmatprep.mubr.msk.f32.mxu0 %vm642_vm1, %v970_v41 }
 0x1b6   : > { %3473 = vmatpush3.bf16.msra.mxu0 %v3997_v51 }
 0x1b7   : > { %3475 = vmatprep.subr.bf16.mxu0 %v4002_v57  ;;  %v3633_v8 = vpop.permute.xlu1 %3632  ;;  %v974_v40 = vpop.permute.xlu0 %973 }
 0x1b8   : > { %3129 = vmatmul.mubr.msk.f32.gmra.mrb[12].mxu1 %vm642_vm1, %v799_v52  ;;  %3154 = vmatmul.mubr.msk.f32.gmra.mrb[34].mxu0 %vm642_vm1, %v972_v13  ;;  %v3635_v14 = vunpack.i.h.bf16 %v3633_v8  ;;  %v3634_v51 = vunpack.i.l.bf16 %v3633_v8 }
 0x1b9   : > { %3131 = vmatprep.mubr.msk.f32.mxu1 %vm642_vm1, %v801_v59  ;;  %3156 = vmatprep.mubr.msk.f32.mxu0 %vm642_vm1, %v974_v40 }
 0x1ba   : > { %3457 = vmatpush3.bf16.xpose.msk.msra.mxu1 %vm4134_vm2, %v3452_v47  ;;  %3477 = vmatpush3.bf16.msra.mxu0 %v4002_v57  ;;  %v3464_v49 = vpack.c.bf16 %v3635_v14, %v3634_v51 }
 0x1bb   : > { %3479 = vmatprep.subr.bf16.mxu0 %v4007_v63  ;;  %v976_v43 = vpop.permute.xlu1 %975  ;;  %v978_v45 = vpop.permute.xlu0 %977  ;;  %3460 = vmatprep.subr.msk.bf16.mxu1 %vm4134_vm2, %v3458_v10 }
 0x1bc   : > { %3132 = vmatmul.mubr.msk.f32.gmra.mrb[14].mxu1 %vm642_vm1, %v803_v54  ;;  %3157 = vmatmul.mubr.msk.f32.gmra.mrb[36].mxu0 %vm642_vm1, %v976_v43 }
 0x1bd   : > { %3159 = vmatprep.mubr.msk.f32.mxu0 %vm642_vm1, %v978_v45 }
 0x1be   : > { %3481 = vmatpush3.bf16.msra.mxu0 %v4007_v63 }
 0x1bf   : > { %3483 = vmatprep.subr.bf16.mxu0 %v4013_v5  ;;  %v980_v57 = vpop.permute.xlu1 %979  ;;  %v1143_v18 = vpop.permute.xlu0 %1142 }
 0x1c0   : > { %3160 = vmatmul.mubr.msk.f32.gmra.mrb[38].mxu0 %vm642_vm1, %v980_v57  ;;  %3178 = vmatprep.mubr.msk.f32.mxu1 %vm642_vm1, %v1143_v18 }
 0x1c2   : > { %3463 = vmatpush3.bf16.xpose.msk.msra.mxu1 %vm4134_vm2, %v3458_v10  ;;  %3485 = vmatpush3.bf16.msra.mxu0 %v4013_v5 }
 0x1c3   : > { %3487 = vmatprep.subr.bf16.mxu0 %v4018_v11  ;;  %3466 = vmatprep.subr.msk.bf16.mxu1 %vm4134_vm2, %v3464_v49  ;;  %v1145_v63 = vpop.permute.xlu1 %1144  ;;  %v1147_v52 = vpop.permute.xlu0 %1146 }
 0x1c7   : > { %v1149_v56 = vpop.permute.xlu1 %1148  ;;  %v1151_v5 = vpop.permute.xlu0 %1150 }
 0x1ca   : > { %3469 = vmatpush3.bf16.xpose.msk.msra.mxu1 %vm4134_vm2, %v3464_v49 }
 0x1cb   : > { %3503 = vmatprep.subr.bf16.mxu1 %v4062_v62  ;;  %v1153_v58 = vpop.permute.xlu1 %1152  ;;  %v1155_v44 = vpop.permute.xlu0 %1154 }
 0x1d1   : > { %3179 = vmatmul.mubr.msk.f32.vlgmr.msra.gmra.mrb[16].mxu1 %vm642_vm1, %v1145_v63 }
 0x1d2   : > { %3181 = vmatprep.mubr.msk.f32.mxu1 %vm642_vm1, %v1147_v52  ;;  %3505 = vmatpush3.bf16.msra.mxu1 %v4062_v62  ;;  %v1157_v62 = vpop.permute.xlu1 %1156 }
 0x1d3   : > { %3507 = vmatprep.subr.bf16.mxu1 %v4068_v2 }
 0x1d5   : > { %3182 = vmatmul.mubr.msk.f32.gmra.mrb[18].mxu1 %vm642_vm1, %v1149_v56 }
 0x1d6   : > { %3184 = vmatprep.mubr.msk.f32.mxu1 %vm642_vm1, %v1151_v5  ;;  %3509 = vmatpush3.bf16.msra.mxu1 %v4068_v2 }
 0x1d7   : > { %3511 = vmatprep.subr.bf16.mxu1 %v4074_v0 }
 0x1d9   : > { %3185 = vmatmul.mubr.msk.f32.gmra.mrb[20].mxu1 %vm642_vm1, %v1153_v58 }
 0x1da   : > { %3187 = vmatprep.mubr.msk.f32.mxu1 %vm642_vm1, %v1155_v44  ;;  %3513 = vmatpush3.bf16.msra.mxu1 %v4074_v0 }
 0x1db   : > { %3515 = vmatprep.subr.bf16.mxu1 %v4080_v60 }
 0x1dd   : > { %3188 = vmatmul.mubr.msk.f32.gmra.mrb[22].mxu1 %vm642_vm1, %v1157_v62 }
 0x1de   : > { %3517 = vmatpush3.bf16.msra.mxu1 %v4080_v60 }
 0x263   : > { %v4251_v1 = vpop.f32.mrb[0].mxu1 }
 0x264   : > { %v4253_v4 = vpop.f32.mrb[1].mxu1  ;;  %v1314_v2 = vsel %vm280_vm0, %v4251_v1, -inf }
 0x265   : > { %1315 = vmax.xlane.f32.xlu1 %v1314_v2  ;;  %v1311_v46 = vsel %vm280_vm0, %v4253_v4, -inf }
 0x266   : > { %1312 = vmax.xlane.f32.xlu0 %v1311_v46 }
 0x267   : > { %v4259_v0 = vpop.f32.mrb[2].mxu1 }
 0x268   : > { %v4261_v50 = vpop.f32.mrb[3].mxu1  ;;  %v1320_v3 = vsel %vm280_vm0, %v4259_v0, -inf }
 0x269   : > { %v1317_v59 = vsel %vm280_vm0, %v4261_v50, -inf }
 0x26a   : > { %1318 = vmax.xlane.f32.xlu0 %v1317_v59 }
 0x26b   : > { %v4265_v60 = vpop.f32.mrb[4].mxu1 }
 0x26c   : > { %v4267_v15 = vpop.f32.mrb[5].mxu1  ;;  %v1326_v61 = vsel %vm280_vm0, %v4265_v60, -inf }
 0x26d   : > { %v1323_v54 = vsel %vm280_vm0, %v4267_v15, -inf }
 0x26e   : > { %1321 = vmax.xlane.f32.xlu0 %v1320_v3  ;;  %1324 = vmax.xlane.f32.xlu1 %v1323_v54 }
 0x26f   : > { %v4273_v9 = vpop.f32.mrb[6].mxu1 }
 0x270   : > { %v4275_v47 = vpop.f32.mrb[7].mxu1  ;;  %v1332_v16 = vsel %vm280_vm0, %v4273_v9, -inf }
 0x271   : > { %v1329_v19 = vsel %vm280_vm0, %v4275_v47, -inf }
 0x272   : > { %1327 = vmax.xlane.f32.xlu0 %v1326_v61  ;;  %1330 = vmax.xlane.f32.xlu1 %v1329_v19 }
 0x276   : > { %1333 = vmax.xlane.f32.xlu0 %v1332_v16 }
 0x283   : > { %v4283_v53 = vpop.f32.mrb[8].mxu1 }
 0x284   : > { %v4285_v41 = vpop.f32.mrb[9].mxu1  ;;  %v1338_v13 = vsel %vm280_vm0, %v4283_v53, -inf }
 0x285   : > { %1339 = vmax.xlane.f32.xlu0 %v1338_v13  ;;  %v1335_v10 = vsel %vm280_vm0, %v4285_v41, -inf }
 0x286   : > { %1336 = vmax.xlane.f32.xlu1 %v1335_v10 }
 0x287   : > { %v4291_v8 = vpop.f32.mrb[10].mxu1  ;;  %v4293_v40 = vpop.f32.mrb[32].mxu0 }
 0x288   : > { %v4295_v14 = vpop.f32.mrb[11].mxu1  ;;  %v4297_v51 = vpop.f32.mrb[33].mxu0  ;;  %v1344_v43 = vsel %vm280_vm0, %v4291_v8, -inf  ;;  %v1362_v54 = vsel %vm280_vm0, %v4293_v40, -inf }
 0x289   : > { %1345 = vmax.xlane.f32.xlu0 %v1344_v43  ;;  %v1341_v45 = vsel %vm280_vm0, %v4295_v14, -inf  ;;  %v1359_v61 = vsel %vm280_vm0, %v4297_v51, -inf }
 0x28a   : > { %1342 = vmax.xlane.f32.xlu1 %v1341_v45 }
 0x28b   : > { %v4303_v49 = vpop.f32.mrb[12].mxu1  ;;  %v4305_v57 = vpop.f32.mrb[34].mxu0 }
 0x28c   : > { %v4307_v18 = vpop.f32.mrb[13].mxu1  ;;  %v4309_v63 = vpop.f32.mrb[35].mxu0  ;;  %v1350_v52 = vsel %vm280_vm0, %v4303_v49, -inf  ;;  %v1368_v19 = vsel %vm280_vm0, %v4305_v57, -inf }
 0x28d   : > { %1351 = vmax.xlane.f32.xlu0 %v1350_v52  ;;  %v1347_v56 = vsel %vm280_vm0, %v4307_v18, -inf  ;;  %v1365_v16 = vsel %vm280_vm0, %v4309_v63, -inf }
 0x28e   : > { %1348 = vmax.xlane.f32.xlu1 %v1347_v56 }
 0x28f   : > { %v4315_v5 = vpop.f32.mrb[14].mxu1  ;;  %v4317_v58 = vpop.f32.mrb[36].mxu0 }
 0x290   : > { %v4319_v44 = vpop.f32.mrb[15].mxu1  ;;  %v4321_v62 = vpop.f32.mrb[37].mxu0  ;;  %v1356_v2 = vsel %vm280_vm0, %v4315_v5, -inf  ;;  %v1374_v13 = vsel %vm280_vm0, %v4317_v58, -inf }
 0x291   : > { %1357 = vmax.xlane.f32.xlu0 %v1356_v2  ;;  %v1353_v46 = vsel %vm280_vm0, %v4319_v44, -inf  ;;  %v1371_v10 = vsel %vm280_vm0, %v4321_v62, -inf }
 0x292   : > { %1354 = vmax.xlane.f32.xlu1 %v1353_v46 }
 0x293   : > { %v4327_v59 = vpop.f32.mrb[38].mxu0 }
 0x294   : > { %v4329_v3 = vpop.f32.mrb[39].mxu0  ;;  %v1380_v43 = vsel %vm280_vm0, %v4327_v59, -inf }
 0x295   : > { %1363 = vmax.xlane.f32.xlu0 %v1362_v54  ;;  %v1377_v45 = vsel %vm280_vm0, %v4329_v3, -inf }
 0x296   : > { %1360 = vmax.xlane.f32.xlu1 %v1359_v61 }
 0x299   : > { %1369 = vmax.xlane.f32.xlu0 %v1368_v19 }
 0x29a   : > { %1366 = vmax.xlane.f32.xlu1 %v1365_v16 }
 0x29d   : > { %1375 = vmax.xlane.f32.xlu0 %v1374_v13 }
 0x29e   : > { %1372 = vmax.xlane.f32.xlu1 %v1371_v10 }
 0x2a1   : > { %1381 = vmax.xlane.f32.xlu0 %v1380_v43 }
 0x2a2   : > { %1378 = vmax.xlane.f32.xlu1 %v1377_v45 }
 0x2a4   : > { %v4347_v52 = vpop.f32.mrb[16].mxu1 }
 0x2a5   : > { %v4349_v56 = vpop.f32.mrb[17].mxu1  ;;  %v1386_v2 = vsel %vm280_vm0, %v4347_v52, -inf }
 0x2a6   : > { %1387 = vmax.xlane.f32.xlu0 %v1386_v2  ;;  %v1383_v46 = vsel %vm280_vm0, %v4349_v56, -inf }
 0x2a7   : > { %1384 = vmax.xlane.f32.xlu1 %v1383_v46 }
 0x2a8   : > { %v4355_v54 = vpop.f32.mrb[18].mxu1 }
 0x2a9   : > { %v4357_v61 = vpop.f32.mrb[19].mxu1  ;;  %v1392_v19 = vsel %vm280_vm0, %v4355_v54, -inf }
 0x2aa   : > { %1393 = vmax.xlane.f32.xlu0 %v1392_v19  ;;  %v1389_v16 = vsel %vm280_vm0, %v4357_v61, -inf }
 0x2ab   : > { %1390 = vmax.xlane.f32.xlu1 %v1389_v16 }
 0x2ac   : > { %v4363_v13 = vpop.f32.mrb[20].mxu1 }
 0x2ad   : > { %v4365_v10 = vpop.f32.mrb[21].mxu1  ;;  %v1398_v43 = vsel %vm280_vm0, %v4363_v13, -inf }
 0x2ae   : > { %1399 = vmax.xlane.f32.xlu0 %v1398_v43  ;;  %v1395_v45 = vsel %vm280_vm0, %v4365_v10, -inf }
 0x2af   : > { %1396 = vmax.xlane.f32.xlu1 %v1395_v45 }
 0x2b0   : > { %v4371_v2 = vpop.f32.mrb[22].mxu1 }
 0x2b1   : > { %v4373_v46 = vpop.f32.mrb[23].mxu1  ;;  %v1404_v19 = vsel %vm280_vm0, %v4371_v2, -inf }
 0x2b2   : > { %1405 = vmax.xlane.f32.xlu0 %v1404_v19  ;;  %v1401_v16 = vsel %vm280_vm0, %v4373_v46, -inf }
 0x2b3   : > { %1402 = vmax.xlane.f32.xlu1 %v1401_v16 }
 0x2f2   : > { %v1316_v38 = vpop.xlane.xlu1 %1315 }
 0x2f3   : > { %v1408_v39 = vsub.f32 %v4251_v1, %v1316_v38  ;;  %v1313_v43 = vpop.xlane.xlu0 %1312 }
 0x2f4   : > { %v1407_v36 = vsub.f32 %v4253_v4, %v1313_v43 }
 0x2f5   : > { %v1441_v37 = vmul.f32 1.442695, %v1408_v39 }
 0x2f6   : > { %v1439_v45 = vmul.f32 1.442695, %v1407_v36 }
 0x2f7   : > { %3636 = vpow2.f32 %v1441_v37  ;;  %v1319_v34 = vpop.xlane.xlu0 %1318 }
 0x2f8   : > { %3638 = vpow2.f32 %v1439_v45  ;;  %v1409_v35 = vsub.f32 %v4261_v50, %v1319_v34 }
 0x2fa   : > { %v1443_v32 = vmul.f32 1.442695, %v1409_v35 }
 0x2fb   : > { %v1322_v33 = vpop.xlane.xlu0 %1321  ;;  %v1325_v19 = vpop.xlane.xlu1 %1324 }
 0x2fc   : > { %3640 = vpow2.f32 %v1443_v32  ;;  %v1410_v30 = vsub.f32 %v4259_v0, %v1322_v33  ;;  %v1411_v16 = vsub.f32 %v4267_v15, %v1325_v19 }
 0x2fe   : > { %v1445_v31 = vmul.f32 1.442695, %v1410_v30  ;;  %v1447_v38 = vmul.f32 1.442695, %v1411_v16 }
 0x2ff   : > { %v1328_v1 = vpop.xlane.xlu0 %1327  ;;  %v1331_v28 = vpop.xlane.xlu1 %1330 }
 0x300   : > { %3642 = vpow2.f32 %v1445_v31  ;;  %v1412_v36 = vsub.f32 %v4265_v60, %v1328_v1  ;;  %v1413_v37 = vsub.f32 %v4275_v47, %v1331_v28 }
 0x301   : > { %v3637_v39 = vpop.eup %3636  ;;  %3644 = vpow2.f32 %v1447_v38 }
 0x302   : > { %v3639_v34 = vpop.eup %3638  ;;  %v1449_v35 = vmul.f32 1.442695, %v1412_v36  ;;  %v1451_v4 = vmul.f32 1.442695, %v1413_v37  ;;  %v1506_v32 = vsel %vm280_vm0, %v3637_v39, 0.0 }
 0x303   : > { %3206 = vmatprep.mubr.msk.f32.mxu0 %vm280_vm0, %v3639_v34  ;;  %v1334_v33 = vpop.xlane.xlu0 %1333  ;;  %1507 = vadd.xlane.f32.xlu0 %v1506_v32  ;;  %v1503_v30 = vsel %vm280_vm0, %v3639_v34, 0.0 }
 0x304   : > { %3646 = vpow2.f32 %v1449_v35  ;;  %v1414_v31 = vsub.f32 %v4273_v9, %v1334_v33  ;;  %1504 = vadd.xlane.f32.xlu1 %v1503_v30  ;;  %3207 = vmatmul.mubr.msk.f32.vlgmr.msra.gmra.mrb[40].mxu0 %vm280_vm0, %v3637_v39 }
 0x305   : > { %3648 = vpow2.f32 %v1451_v4  ;;  %3489 = vmatpush3.bf16.msra.mxu0 %v4018_v11 }
 0x306   : > { %v3641_v28 = vpop.eup %3640  ;;  %v1453_v0 = vmul.f32 1.442695, %v1414_v31  ;;  %3491 = vmatprep.subr.bf16.mxu0 %v4028_v17 }
 0x307   : > { %3209 = vmatprep.mubr.msk.f32.mxu0 %vm280_vm0, %v3641_v28  ;;  %v1509_v50 = vsel %vm280_vm0, %v3641_v28, 0.0 }
 0x308   : > { %3650 = vpow2.f32 %v1453_v0  ;;  %1510 = vadd.xlane.f32.xlu1 %v1509_v50 }
 0x309   : > { %3493 = vmatpush3.bf16.msra.mxu0 %v4028_v17 }
 0x30a   : > { %v3643_v60 = vpop.eup %3642  ;;  %3495 = vmatprep.subr.bf16.mxu0 %v4038_v48 }
 0x30b   : > { %v3645_v15 = vpop.eup %3644  ;;  %3210 = vmatmul.mubr.msk.f32.gmra.mrb[42].mxu0 %vm280_vm0, %v3643_v60  ;;  %v1512_v11 = vsel %vm280_vm0, %v3643_v60, 0.0 }
 0x30c   : > { %1513 = vadd.xlane.f32.xlu0 %v1512_v11  ;;  %v1515_v9 = vsel %vm280_vm0, %v3645_v15, 0.0  ;;  %3212 = vmatprep.mubr.msk.f32.mxu0 %vm280_vm0, %v3645_v15 }
 0x30d   : > { %1516 = vadd.xlane.f32.xlu1 %v1515_v9  ;;  %3497 = vmatpush3.bf16.msra.mxu0 %v4038_v48 }
 0x30e   : > { %v3647_v47 = vpop.eup %3646  ;;  %3499 = vmatprep.subr.bf16.mxu0 %v4052_v55 }
 0x30f   : > { %v4403_v17 = vpop.eup %3648  ;;  %3213 = vmatmul.mubr.msk.f32.gmra.mrb[44].mxu0 %vm280_vm0, %v3647_v47  ;;  %v1518_v43 = vsel %vm280_vm0, %v3647_v47, 0.0 }
 0x310   : > { %1519 = vadd.xlane.f32.xlu0 %v1518_v43  ;;  %3215 = vmatprep.mubr.msk.f32.mxu0 %vm280_vm0, %v4403_v17 }
 0x311   : > { %3501 = vmatpush3.bf16.msra.mxu0 %v4052_v55 }
 0x312   : > { %v4410_v45 = vpop.eup %3650  ;;  %3519 = vmatprep.subr.bf16.mxu0 %v4086_v6  ;;  %v1340_v48 = vpop.xlane.xlu0 %1339 }
 0x313   : > { %v1416_v19 = vsub.f32 %v4283_v53, %v1340_v48  ;;  %v1337_v16 = vpop.xlane.xlu1 %1336  ;;  %3216 = vmatmul.mubr.msk.f32.gmra.mrb[46].mxu0 %vm280_vm0, %v4410_v45 }
 0x314   : > { %v1415_v38 = vsub.f32 %v4285_v41, %v1337_v16 }
 0x315   : > { %v1457_v1 = vmul.f32 1.442695, %v1416_v19 }
 0x316   : > { %v1455_v36 = vmul.f32 1.442695, %v1415_v38  ;;  %v1346_v37 = vpop.xlane.xlu0 %1345 }
 0x317   : > { %v1418_v39 = vsub.f32 %v4291_v8, %v1346_v37  ;;  %v1343_v34 = vpop.xlane.xlu1 %1342 }
 0x318   : > { %3652 = vpow2.f32 %v1455_v36  ;;  %v1417_v55 = vsub.f32 %v4295_v14, %v1343_v34 }
 0x319   : > { %3654 = vpow2.f32 %v1457_v1  ;;  %v1461_v35 = vmul.f32 1.442695, %v1418_v39 }
 0x31a   : > { %v1459_v4 = vmul.f32 1.442695, %v1417_v55  ;;  %v1352_v32 = vpop.xlane.xlu0 %1351 }
 0x31b   : > { %v1420_v53 = vsub.f32 %v4303_v49, %v1352_v32  ;;  %v1349_v33 = vpop.xlane.xlu1 %1348 }
 0x31c   : > { %3656 = vpow2.f32 %v1459_v4  ;;  %v1419_v30 = vsub.f32 %v4307_v18, %v1349_v33 }
 0x31d   : > { %3658 = vpow2.f32 %v1461_v35  ;;  %v1465_v41 = vmul.f32 1.442695, %v1420_v53 }
 0x31e   : > { %v1463_v31 = vmul.f32 1.442695, %v1419_v30  ;;  %v1358_v28 = vpop.xlane.xlu0 %1357 }
 0x31f   : > { %v1422_v8 = vsub.f32 %v4315_v5, %v1358_v28  ;;  %v1355_v0 = vpop.xlane.xlu1 %1354 }
 0x320   : > { %3660 = vpow2.f32 %v1463_v31  ;;  %v1421_v14 = vsub.f32 %v4319_v44, %v1355_v0 }
 0x321   : > { %3662 = vpow2.f32 %v1465_v41  ;;  %v1469_v50 = vmul.f32 1.442695, %v1422_v8 }
 0x322   : > { %v4423_v60 = vpop.eup %3652  ;;  %v1467_v15 = vmul.f32 1.442695, %v1421_v14  ;;  %v1364_v49 = vpop.xlane.xlu0 %1363 }
 0x323   : > { %v4425_v11 = vpop.eup %3654  ;;  %v1424_v18 = vsub.f32 %v4293_v40, %v1364_v49  ;;  %v1361_v9 = vpop.xlane.xlu1 %1360  ;;  %3234 = vmatprep.mubr.msk.f32.mxu0 %vm280_vm0, %v4423_v60 }
 0x324   : > { %3664 = vpow2.f32 %v1467_v15  ;;  %v1423_v5 = vsub.f32 %v4297_v51, %v1361_v9  ;;  %3235 = vmatmul.mubr.msk.f32.vlgmr.msra.gmra.mrb[48].mxu0 %vm280_vm0, %v4425_v11 }
 0x325   : > { %3666 = vpow2.f32 %v1469_v50  ;;  %v1473_v44 = vmul.f32 1.442695, %v1424_v18  ;;  %3521 = vmatpush3.bf16.msra.mxu0 %v4086_v6 }
 0x326   : > { %v4434_v47 = vpop.eup %3656  ;;  %v1471_v43 = vmul.f32 1.442695, %v1423_v5  ;;  %3523 = vmatprep.subr.bf16.mxu0 %v4093_v42  ;;  %v1370_v40 = vpop.xlane.xlu0 %1369 }
 0x327   : > { %v4437_v48 = vpop.eup %3658  ;;  %3668 = vpow2.f32 %v1473_v44  ;;  %v1426_v19 = vsub.f32 %v4305_v57, %v1370_v40  ;;  %v1367_v16 = vpop.xlane.xlu1 %1366  ;;  %3237 = vmatprep.mubr.msk.f32.mxu0 %vm280_vm0, %v4434_v47 }
 0x328   : > { %3670 = vpow2.f32 %v1471_v43  ;;  %v1425_v51 = vsub.f32 %v4309_v63, %v1367_v16  ;;  %3238 = vmatmul.mubr.msk.f32.gmra.mrb[50].mxu0 %vm280_vm0, %v4437_v48 }
 0x329   : > { %v1477_v6 = vmul.f32 1.442695, %v1426_v19  ;;  %3525 = vmatpush3.bf16.msra.mxu0 %v4093_v42 }
 0x32a   : > { %v4446_v38 = vpop.eup %3660  ;;  %v1475_v1 = vmul.f32 1.442695, %v1425_v51  ;;  %3527 = vmatprep.subr.bf16.mxu0 %v4099_v12  ;;  %v1376_v36 = vpop.xlane.xlu0 %1375 }
 0x32b   : > { %v3663_v57 = vpop.eup %3662  ;;  %3672 = vpow2.f32 %v1477_v6  ;;  %v1428_v37 = vsub.f32 %v4317_v58, %v1376_v36  ;;  %v1373_v39 = vpop.xlane.xlu1 %1372  ;;  %3240 = vmatprep.mubr.msk.f32.mxu0 %vm280_vm0, %v4446_v38 }
 0x32c   : > { %3674 = vpow2.f32 %v1475_v1  ;;  %v1427_v63 = vsub.f32 %v4321_v62, %v1373_v39  ;;  %3241 = vmatmul.mubr.msk.f32.gmra.mrb[52].mxu0 %vm280_vm0, %v3663_v57  ;;  %v1542_v43 = vsel %vm280_vm0, %v3663_v57, 0.0 }
 0x32d   : > { %v1481_v42 = vmul.f32 1.442695, %v1428_v37  ;;  %3529 = vmatpush3.bf16.msra.mxu0 %v4099_v12 }
 0x32e   : > { %v4455_v34 = vpop.eup %3664  ;;  %v1479_v55 = vmul.f32 1.442695, %v1427_v63  ;;  %3531 = vmatprep.subr.bf16.mxu0 %v4106_v7  ;;  %v1382_v35 = vpop.xlane.xlu0 %1381 }
 0x32f   : > { %v4458_v4 = vpop.eup %3666  ;;  %v1430_v58 = vsub.f32 %v4327_v59, %v1382_v35  ;;  %v1379_v32 = vpop.xlane.xlu1 %1378  ;;  %3243 = vmatprep.mubr.msk.f32.mxu0 %vm280_vm0, %v4455_v34 }
 0x330   : > { %3676 = vpow2.f32 %v1479_v55  ;;  %v1429_v62 = vsub.f32 %v4329_v3, %v1379_v32  ;;  %3244 = vmatmul.mubr.msk.f32.gmra.mrb[54].mxu0 %vm280_vm0, %v4458_v4  ;;  %v1548_v35 = vsel %vm280_vm0, %v4458_v4, 0.0  ;;  %v1521_v4 = vsel %vm280_vm0, %v4403_v17, 0.0 }
 0x331   : > { %v3669_v12 = vpop.eup %3668  ;;  %3678 = vpow2.f32 %v1481_v42  ;;  %v1485_v53 = vmul.f32 1.442695, %v1430_v58  ;;  %3533 = vmatpush3.bf16.msra.mxu0 %v4106_v7  ;;  %v1530_v17 = vsel %vm280_vm0, %v4425_v11, 0.0  ;;  %v2180_v11 = vld [vmem:[%s4737_s3 + $0x8] sm:$0xff] }
 0x332   : > { %v3671_v33 = vpop.eup %3670  ;;  %v1483_v30 = vmul.f32 1.442695, %v1429_v62  ;;  %v1554_v41 = vsel %vm280_vm0, %v3669_v12, 0.0  ;;  %v1545_v62 = vsel %vm280_vm0, %v4455_v34, 0.0  ;;  %v1524_v34 = vsel %vm280_vm0, %v4410_v45, 0.0 }
 0x333   : > { %v1388_v59 = vpop.xlane.xlu0 %1387  ;;  %3262 = vmatprep.mubr.msk.f32.mxu1 %vm280_vm0, %v3671_v33  ;;  %1555 = vadd.xlane.f32.xlu0 %v1554_v41  ;;  %v1551_v31 = vsel %vm280_vm0, %v3671_v33, 0.0 }
 0x334   : > { %3680 = vpow2.f32 %v1483_v30  ;;  %v1432_v3 = vsub.f32 %v4347_v52, %v1388_v59  ;;  %v1385_v28 = vpop.xlane.xlu1 %1384  ;;  %3263 = vmatmul.mubr.msk.f32.vlgmr.msra.gmra.mrb[24].mxu1 %vm280_vm0, %v3669_v12  ;;  %1552 = vadd.xlane.f32.xlu1 %v1551_v31  ;;  %v1527_v30 = vsel %vm280_vm0, %v4423_v60, 0.0  ;;  %v1533_v31 = vsel %vm280_vm0, %v4434_v47, 0.0 }
 0x335   : > { %v3673_v8 = vpop.eup %3672  ;;  %3682 = vpow2.f32 %v1485_v53  ;;  %v1431_v7 = vsub.f32 %v4349_v56, %v1385_v28  ;;  %v1536_v60 = vsel %vm280_vm0, %v4437_v48, 0.0  ;;  %v2181_v48 = vld [vmem:[%s4737_s3 + $0x10] sm:$0xff] }
 0x336   : > { %v3675_v0 = vpop.eup %3674  ;;  %v1489_v14 = vmul.f32 1.442695, %v1432_v3  ;;  %v1560_v50 = vsel %vm280_vm0, %v3673_v8, 0.0  ;;  %v2179_v3 = vld [vmem:[%s4737_s3] sm:$0xff] }
 0x337   : > { %v1487_v15 = vmul.f32 1.442695, %v1431_v7  ;;  %v1394_v49 = vpop.xlane.xlu0 %1393  ;;  %3265 = vmatprep.mubr.msk.f32.mxu1 %vm280_vm0, %v3675_v0  ;;  %1561 = vadd.xlane.f32.xlu0 %v1560_v50  ;;  %v1557_v18 = vsel %vm280_vm0, %v3675_v0, 0.0  ;;  %v3534_v28 = vpack.c.bf16 %v2180_v11, %v2179_v3  ;;  %v2182_v7 = vld [vmem:[%s4737_s3 + $0x18] sm:$0xff] }
 0x338   : > { %v1434_v52 = vsub.f32 %v4355_v54, %v1394_v49  ;;  %v1391_v9 = vpop.xlane.xlu1 %1390  ;;  %3266 = vmatmul.mubr.msk.f32.gmra.mrb[26].mxu1 %vm280_vm0, %v3673_v8  ;;  %1558 = vadd.xlane.f32.xlu1 %v1557_v18  ;;  %v1539_v54 = vsel %vm280_vm0, %v4446_v38, 0.0 }
 0x339   : > { %3684 = vpow2.f32 %v1487_v15  ;;  %v1433_v56 = vsub.f32 %v4357_v61, %v1391_v9  ;;  %3535 = vmatprep.subr.bf16.mxu0 %v3534_v28  ;;  %3542 = vmatprep.subr.bf16.mxu1 %v3534_v28 }
 0x33a   : > { %v3677_v5 = vpop.eup %3676  ;;  %3686 = vpow2.f32 %v1489_v14  ;;  %v1493_v44 = vmul.f32 1.442695, %v1434_v52  ;;  %3544 = vmatpush3.bf16.msra.mxu1 %v3534_v28  ;;  %v3538_v14 = vpack.c.bf16 %v2182_v7, %v2181_v48 }
 0x33b   : > { %v3679_v40 = vpop.eup %3678  ;;  %v1491_v19 = vmul.f32 1.442695, %v1433_v56  ;;  %v1400_v16 = vpop.xlane.xlu0 %1399  ;;  %3268 = vmatprep.mubr.msk.f32.mxu1 %vm280_vm0, %v3677_v5  ;;  %1543 = vadd.xlane.f32.xlu0 %v1542_v43 }
 0x33c   : > { %v1436_v51 = vsub.f32 %v4363_v13, %v1400_v16  ;;  %v1397_v6 = vpop.xlane.xlu1 %1396  ;;  %3269 = vmatmul.mubr.msk.f32.gmra.mrb[28].mxu1 %vm280_vm0, %v3679_v40  ;;  %1540 = vadd.xlane.f32.xlu1 %v1539_v54  ;;  %v1566_v57 = vsel %vm280_vm0, %v3679_v40, 0.0  ;;  %v1563_v13 = vsel %vm280_vm0, %v3677_v5, 0.0 }
 0x33d   : > { %3688 = vpow2.f32 %v1491_v19  ;;  %v1435_v61 = vsub.f32 %v4365_v10, %v1397_v6  ;;  %3543 = vmatprep.subr.bf16.mxu1 %v3538_v14 }
 0x33e   : > { %v3681_v1 = vpop.eup %3680  ;;  %3690 = vpow2.f32 %v1493_v44  ;;  %v1497_v36 = vmul.f32 1.442695, %v1436_v51  ;;  %3545 = vmatpush3.bf16.msra.mxu1 %v3538_v14 }
 0x33f   : > { %v3683_v37 = vpop.eup %3682  ;;  %v1495_v39 = vmul.f32 1.442695, %v1435_v61  ;;  %v1406_v63 = vpop.xlane.xlu0 %1405  ;;  %3271 = vmatprep.mubr.msk.f32.mxu1 %vm280_vm0, %v3681_v1  ;;  %1567 = vadd.xlane.f32.xlu0 %v1566_v57  ;;  %v1569_v47 = vsel %vm280_vm0, %v3681_v1, 0.0 }
 0x340   : > { %v1438_v38 = vsub.f32 %v4371_v2, %v1406_v63  ;;  %v1403_v42 = vpop.xlane.xlu1 %1402  ;;  %3272 = vmatmul.mubr.msk.f32.gmra.mrb[30].mxu1 %vm280_vm0, %v3683_v37  ;;  %1564 = vadd.xlane.f32.xlu1 %v1563_v13  ;;  %v1572_v2 = vsel %vm280_vm0, %v3683_v37, 0.0 }
 0x341   : > { %3692 = vpow2.f32 %v1495_v39  ;;  %v1437_v10 = vsub.f32 %v4373_v46, %v1403_v42 }
 0x342   : > { %3694 = vpow2.f32 %v1497_v36  ;;  %v1501_v55 = vmul.f32 1.442695, %v1438_v38 }
 0x343   : > { %v3685_v58 = vpop.eup %3684  ;;  %v1499_v32 = vmul.f32 1.442695, %v1437_v10  ;;  %1549 = vadd.xlane.f32.xlu0 %v1548_v35 }
 0x344   : > { %v3687_v12 = vpop.eup %3686  ;;  %3290 = vmatprep.mubr.msk.f32.mxu0 %vm280_vm0, %v3685_v58  ;;  %1546 = vadd.xlane.f32.xlu1 %v1545_v62  ;;  %v1575_v0 = vsel %vm280_vm0, %v3685_v58, 0.0 }
 0x345   : > { %3696 = vpow2.f32 %v1499_v32  ;;  %3291 = vmatmul.mubr.msk.f32.vlgmr.msra.gmra.mrb[56].mxu0 %vm280_vm0, %v3687_v12  ;;  %v1578_v8 = vsel %vm280_vm0, %v3687_v12, 0.0 }
 0x346   : > { %3698 = vpow2.f32 %v1501_v55  ;;  %3537 = vmatpush3.bf16.msra.mxu0 %v3534_v28 }
 0x347   : > { %v3689_v46 = vpop.eup %3688  ;;  %1573 = vadd.xlane.f32.xlu0 %v1572_v2  ;;  %3539 = vmatprep.subr.bf16.mxu0 %v3538_v14 }
 0x348   : > { %v3691_v53 = vpop.eup %3690  ;;  %3293 = vmatprep.mubr.msk.f32.mxu0 %vm280_vm0, %v3689_v46  ;;  %1522 = vadd.xlane.f32.xlu1 %v1521_v4  ;;  %v1581_v15 = vsel %vm280_vm0, %v3689_v46, 0.0 }
 0x349   : > { %3294 = vmatmul.mubr.msk.f32.gmra.mrb[58].mxu0 %vm280_vm0, %v3691_v53  ;;  %v1584_v50 = vsel %vm280_vm0, %v3691_v53, 0.0 }
 0x34a   : > { %3541 = vmatpush3.bf16.msra.mxu0 %v3538_v14 }
 0x34b   : > { %v3693_v33 = vpop.eup %3692  ;;  %1525 = vadd.xlane.f32.xlu0 %v1524_v34 }
 0x34c   : > { %v3695_v41 = vpop.eup %3694  ;;  %3296 = vmatprep.mubr.msk.f32.mxu0 %vm280_vm0, %v3693_v33  ;;  %1528 = vadd.xlane.f32.xlu1 %v1527_v30  ;;  %v1587_v18 = vsel %vm280_vm0, %v3693_v33, 0.0 }
 0x34d   : > { %3297 = vmatmul.mubr.msk.f32.gmra.mrb[60].mxu0 %vm280_vm0, %v3695_v41  ;;  %v1590_v49 = vsel %vm280_vm0, %v3695_v41, 0.0 }
 0x34f   : > { %v3697_v59 = vpop.eup %3696  ;;  %1531 = vadd.xlane.f32.xlu0 %v1530_v17 }
 0x350   : > { %v3699_v45 = vpop.eup %3698  ;;  %3299 = vmatprep.mubr.msk.f32.mxu0 %vm280_vm0, %v3697_v59  ;;  %1534 = vadd.xlane.f32.xlu1 %v1533_v31  ;;  %v1593_v9 = vsel %vm280_vm0, %v3697_v59, 0.0 }
 0x351   : > { %3300 = vmatmul.mubr.msk.f32.gmra.mrb[62].mxu0 %vm280_vm0, %v3699_v45  ;;  %v1596_v52 = vsel %vm280_vm0, %v3699_v45, 0.0 }
 0x353   : > { %1537 = vadd.xlane.f32.xlu0 %v1536_v60 }
 0x354   : > { %1570 = vadd.xlane.f32.xlu1 %v1569_v47 }
 0x357   : > { %1579 = vadd.xlane.f32.xlu0 %v1578_v8 }
 0x358   : > { %1576 = vadd.xlane.f32.xlu1 %v1575_v0 }
 0x35b   : > { %1585 = vadd.xlane.f32.xlu0 %v1584_v50 }
 0x35c   : > { %1582 = vadd.xlane.f32.xlu1 %v1581_v15 }
 0x35f   : > { %1591 = vadd.xlane.f32.xlu0 %v1590_v49 }
 0x360   : > { %1588 = vadd.xlane.f32.xlu1 %v1587_v18 }
 0x363   : > { %1597 = vadd.xlane.f32.xlu0 %v1596_v52 }
 0x364   : > { %1594 = vadd.xlane.f32.xlu1 %v1593_v9 }
 0x390   : > { %v1508_v5 = vpop.xlane.xlu0 %1507 }
 0x391   : > { %v1505_v56 = vpop.xlane.xlu1 %1504 }
 0x392   : > { %3700 = vrcp.f32 %v1505_v56 }
 0x393   : > { %3702 = vrcp.f32 %v1508_v5 }
 0x395   : > { %v1511_v43 = vpop.xlane.xlu1 %1510 }
 0x396   : > { %3704 = vrcp.f32 %v1511_v43 }
 0x399   : > { %v1514_v44 = vpop.xlane.xlu0 %1513 }
 0x39a   : > { %v1517_v19 = vpop.xlane.xlu1 %1516  ;;  %3706 = vrcp.f32 %v1514_v44 }
 0x39b   : > { %3708 = vrcp.f32 %v1517_v19 }
 0x39c   : > { %v3701_v38 = vpop.eup %3700 }
 0x39d   : > { %v1520_v40 = vpop.xlane.xlu0 %1519  ;;  %v3703_v10 = vpop.eup %3702 }
 0x39e   : > { %3710 = vrcp.f32 %v1520_v40 }
 0x3a0   : > { %v3705_v12 = vpop.eup %3704 }
 0x3a4   : > { %v3707_v46 = vpop.eup %3706 }
 0x3a5   : > { %v3709_v33 = vpop.eup %3708 }
 0x3a8   : > { %v3711_v41 = vpop.eup %3710 }
 0x3c0   : > { %v4538_v16 = vpop.xlane.xlu0 %1555 }
 0x3c1   : > { %v4540_v54 = vpop.xlane.xlu1 %1552 }
 0x3c4   : > { %v4542_v51 = vpop.xlane.xlu0 %1561 }
 0x3c5   : > { %v4544_v6 = vpop.xlane.xlu1 %1558 }
 0x3c8   : > { %v1544_v61 = vpop.xlane.xlu0 %1543 }
 0x3c9   : > { %v1541_v1 = vpop.xlane.xlu1 %1540 }
 0x3cc   : > { %v4546_v36 = vpop.xlane.xlu0 %1567 }
 0x3cd   : > { %v4548_v57 = vpop.xlane.xlu1 %1564 }
 0x3d0   : > { %v1550_v37 = vpop.xlane.xlu0 %1549 }
 0x3d1   : > { %v1547_v39 = vpop.xlane.xlu1 %1546 }
 0x3d4   : > { %v4550_v63 = vpop.xlane.xlu0 %1573 }
 0x3d5   : > { %v1523_v35 = vpop.xlane.xlu1 %1522 }
 0x3d6   : > { %3712 = vrcp.f32 %v1523_v35 }
 0x3d7   : > { %v3208_v13 = vpop.f32.mrb[40].mxu0 }
 0x3d8   : > { %v1689_v42 = vpop.f32.mrb[41].mxu0  ;;  %v2148_v58 = vmul.f32 %v3703_v10, %v3208_v13  ;;  %v1526_v32 = vpop.xlane.xlu0 %1525 }
 0x3d9   : > { %v2147_v55 = vmul.f32 %v3701_v38, %v1689_v42  ;;  %3714 = vrcp.f32 %v1526_v32  ;;  %v1529_v47 = vpop.xlane.xlu1 %1528 }
 0x3da   : > { %3716 = vrcp.f32 %v1529_v47 }
 0x3db   : > { %3310 = vmatprep.mubr.msk.f32.mxu0 %vm642_vm1, %v2147_v55 }
 0x3dc   : > { %3311 = vmatmul.mubr.msk.f32.vlgmr.msra.gmra.mrb[64].mxu0 %vm642_vm1, %v2148_v58  ;;  %v1532_v8 = vpop.xlane.xlu0 %1531 }
 0x3dd   : > { %3718 = vrcp.f32 %v1532_v8  ;;  %v1535_v48 = vpop.xlane.xlu1 %1534 }
 0x3de   : > { %v3211_v62 = vpop.f32.mrb[42].mxu0  ;;  %3720 = vrcp.f32 %v1535_v48 }
 0x3df   : > { %v1699_v2 = vpop.f32.mrb[43].mxu0  ;;  %v2150_v53 = vmul.f32 %v3707_v46, %v3211_v62 }
 0x3e0   : > { %v2149_v4 = vmul.f32 %v3705_v12, %v1699_v2  ;;  %v3713_v45 = vpop.eup %3712  ;;  %v1538_v7 = vpop.xlane.xlu0 %1537 }
 0x3e1   : > { %3722 = vrcp.f32 %v1538_v7 }
 0x3e2   : > { %v3214_v34 = vpop.f32.mrb[44].mxu0  ;;  %3313 = vmatprep.mubr.msk.f32.mxu0 %vm642_vm1, %v2149_v4  ;;  %3724 = vrcp.f32 %v1541_v1 }
 0x3e3   : > { %v1709_v30 = vpop.f32.mrb[45].mxu0  ;;  %3314 = vmatmul.mubr.msk.f32.gmra.mrb[66].mxu0 %vm642_vm1, %v2150_v53  ;;  %v2152_v59 = vmul.f32 %v3711_v41, %v3214_v34  ;;  %v3715_v3 = vpop.eup %3714  ;;  %3726 = vrcp.f32 %v1544_v61 }
 0x3e4   : > { %v2151_v17 = vmul.f32 %v3709_v33, %v1709_v30  ;;  %v3717_v14 = vpop.eup %3716  ;;  %3728 = vrcp.f32 %v1547_v39  ;;  %v1571_v61 = vpop.xlane.xlu1 %1570 }
 0x3e5   : > { %3730 = vrcp.f32 %v1550_v37  ;;  %v1580_v58 = vpop.xlane.xlu0 %1579 }
 0x3e6   : > { %v3217_v31 = vpop.f32.mrb[46].mxu0  ;;  %3316 = vmatprep.mubr.msk.f32.mxu0 %vm642_vm1, %v2151_v17  ;;  %3732 = vrcp.f32 %v4540_v54 }
 0x3e7   : > { %v1719_v60 = vpop.f32.mrb[47].mxu0  ;;  %3317 = vmatmul.mubr.msk.f32.gmra.mrb[68].mxu0 %vm642_vm1, %v2152_v59  ;;  %v2154_v28 = vmul.f32 %v3715_v3, %v3217_v31  ;;  %v3719_v15 = vpop.eup %3718  ;;  %3734 = vrcp.f32 %v4538_v16 }
 0x3e8   : > { %v2153_v11 = vmul.f32 %v3713_v45, %v1719_v60  ;;  %v3721_v9 = vpop.eup %3720  ;;  %3736 = vrcp.f32 %v4544_v6  ;;  %v1577_v55 = vpop.xlane.xlu1 %1576 }
 0x3e9   : > { %3738 = vrcp.f32 %v4542_v51  ;;  %v1586_v34 = vpop.xlane.xlu0 %1585 }
 0x3ea   : > { %3319 = vmatprep.mubr.msk.f32.mxu0 %vm642_vm1, %v2153_v11  ;;  %3740 = vrcp.f32 %v4548_v57 }
 0x3eb   : > { %3320 = vmatmul.mubr.msk.f32.gmra.mrb[70].mxu0 %vm642_vm1, %v2154_v28  ;;  %v3723_v5 = vpop.eup %3722  ;;  %3742 = vrcp.f32 %v4546_v36 }
 0x3ec   : > { %v3725_v19 = vpop.eup %3724  ;;  %3744 = vrcp.f32 %v1571_v61  ;;  %v1583_v4 = vpop.xlane.xlu1 %1582 }
 0x3ed   : > { %v3727_v37 = vpop.eup %3726  ;;  %3746 = vrcp.f32 %v4550_v63  ;;  %v1592_v3 = vpop.xlane.xlu0 %1591 }
 0x3ee   : > { %v3729_v54 = vpop.eup %3728  ;;  %3748 = vrcp.f32 %v1577_v55 }
 0x3ef   : > { %v3731_v42 = vpop.eup %3730  ;;  %3750 = vrcp.f32 %v1580_v58  ;;  %v4594_v58 = vld [vmem:[%s4738_s4] ss:$0 sm:$0xff] }
 0x3f0   : > { %v3733_v51 = vpop.eup %3732  ;;  %v1589_v45 = vpop.xlane.xlu1 %1588  ;;  %3752 = vrcp.f32 %v1583_v4 }
 0x3f1   : > { %v3735_v62 = vpop.eup %3734  ;;  %3754 = vrcp.f32 %v1586_v34 }
 0x3f2   : > { %v3737_v57 = vpop.eup %3736  ;;  %3756 = vrcp.f32 %v1589_v45 }
 0x3f3   : > { %v3739_v53 = vpop.eup %3738  ;;  %3758 = vrcp.f32 %v1592_v3 }
 0x3f4   : > { %v3741_v17 = vpop.eup %3740 }
 0x3f5   : > { %v3743_v63 = vpop.eup %3742 }
 0x3f6   : > { %v3745_v47 = vpop.eup %3744 }
 0x3f7   : > { %v3236_v0 = vpop.f32.mrb[48].mxu0  ;;  %v3747_v8 = vpop.eup %3746 }
 0x3f8   : > { %v1818_v50 = vpop.f32.mrb[49].mxu0  ;;  %v2156_v18 = vmul.f32 %v3719_v15, %v3236_v0  ;;  %v1595_v0 = vpop.xlane.xlu1 %1594 }
 0x3f9   : > { %v2155_v49 = vmul.f32 %v3717_v14, %v1818_v50  ;;  %v3749_v50 = vpop.eup %3748  ;;  %v1598_v15 = vpop.xlane.xlu0 %1597  ;;  %3760 = vrcp.f32 %v1595_v0 }
 0x3fa   : > { %3762 = vrcp.f32 %v1598_v15 }
 0x3fb   : > { %v3239_v52 = vpop.f32.mrb[50].mxu0  ;;  %3322 = vmatprep.mubr.msk.f32.mxu0 %vm642_vm1, %v2155_v49 }
 0x3fc   : > { %v1828_v56 = vpop.f32.mrb[51].mxu0  ;;  %3323 = vmatmul.mubr.msk.f32.gmra.mrb[72].mxu0 %vm642_vm1, %v2156_v18  ;;  %v2158_v43 = vmul.f32 %v3723_v5, %v3239_v52  ;;  %v3751_v18 = vpop.eup %3750 }
 0x3fd   : > { %v2157_v44 = vmul.f32 %v3721_v9, %v1828_v56  ;;  %v3753_v5 = vpop.eup %3752 }
 0x3ff   : > { %v3242_v40 = vpop.f32.mrb[52].mxu0  ;;  %3325 = vmatprep.mubr.msk.f32.mxu0 %vm642_vm1, %v2157_v44 }
 0x400   : > { %v1838_v1 = vpop.f32.mrb[53].mxu0  ;;  %3326 = vmatmul.mubr.msk.f32.gmra.mrb[74].mxu0 %vm642_vm1, %v2158_v43  ;;  %v2160_v13 = vmul.f32 %v3727_v37, %v3242_v40  ;;  %v3755_v43 = vpop.eup %3754 }
 0x401   : > { %v2159_v39 = vmul.f32 %v3725_v19, %v1838_v1  ;;  %v3757_v1 = vpop.eup %3756 }
 0x403   : > { %v3245_v38 = vpop.f32.mrb[54].mxu0  ;;  %3328 = vmatprep.mubr.msk.f32.mxu1 %vm642_vm1, %v2159_v39  ;;  %v3759_v39 = vpop.eup %3758 }
 0x404   : > { %v1848_v16 = vpop.f32.mrb[55].mxu0  ;;  %3329 = vmatmul.mubr.msk.f32.vlgmr.msra.gmra.mrb[32].mxu1 %vm642_vm1, %v2160_v13  ;;  %v2162_v35 = vmul.f32 %v3731_v42, %v3245_v38 }
 0x405   : > { %v2161_v10 = vmul.f32 %v3729_v54, %v1848_v16  ;;  %v3761_v16 = vpop.eup %3760 }
 0x407   : > { %v3264_v6 = vpop.f32.mrb[24].mxu1  ;;  %3331 = vmatprep.mubr.msk.f32.mxu1 %vm642_vm1, %v2161_v10  ;;  %v3763_v10 = vpop.eup %3762 }
 0x408   : > { %v1947_v32 = vpop.f32.mrb[25].mxu1  ;;  %3332 = vmatmul.mubr.msk.f32.gmra.mrb[34].mxu1 %vm642_vm1, %v2162_v35  ;;  %v2164_v2 = vmul.f32 %v3735_v62, %v3264_v6 }
 0x409   : > { %v2163_v12 = vmul.f32 %v3733_v51, %v1947_v32 }
 0x40b   : > { %v3267_v46 = vpop.f32.mrb[26].mxu1  ;;  %3334 = vmatprep.mubr.msk.f32.mxu1 %vm642_vm1, %v2163_v12  ;;  %v3764_v12 = vld [vmem:[%s3852_s15 + $0x8] sm:$0xff] }
 0x40c   : > { %v1957_v36 = vpop.f32.mrb[27].mxu1  ;;  %3335 = vmatmul.mubr.msk.f32.gmra.mrb[36].mxu1 %vm642_vm1, %v2164_v2  ;;  %v2166_v30 = vmul.f32 %v3739_v53, %v3267_v46  ;;  %v3765_v46 = vld [vmem:[%s3852_s15] sm:$0xff] }
 0x40d   : > { %v2165_v33 = vmul.f32 %v3737_v57, %v1957_v36 }
 0x40f   : > { %v3270_v41 = vpop.f32.mrb[28].mxu1  ;;  %3337 = vmatprep.mubr.msk.f32.mxu1 %vm642_vm1, %v2165_v33 }
 0x410   : > { %v1967_v59 = vpop.f32.mrb[29].mxu1  ;;  %3338 = vmatmul.mubr.msk.f32.gmra.mrb[38].mxu1 %vm642_vm1, %v2166_v30  ;;  %v2168_v60 = vmul.f32 %v3743_v63, %v3270_v41 }
 0x411   : > { %v2167_v31 = vmul.f32 %v3741_v17, %v1967_v59 }
 0x413   : > { %v3273_v11 = vpop.f32.mrb[30].mxu1  ;;  %3340 = vmatprep.mubr.msk.f32.mxu1 %vm642_vm1, %v2167_v31 }
 0x414   : > { %v1977_v28 = vpop.f32.mrb[31].mxu1  ;;  %3341 = vmatmul.mubr.msk.f32.gmra.mrb[40].mxu1 %vm642_vm1, %v2168_v60  ;;  %v2170_v7 = vmul.f32 %v3747_v8, %v3273_v11 }
 0x415   : > { %v2169_v48 = vmul.f32 %v3745_v47, %v1977_v28 }
 0x417   : > { %3343 = vmatprep.mubr.msk.f32.mxu1 %vm642_vm1, %v2169_v48 }
 0x418   : > { %v3292_v14 = vpop.f32.mrb[56].mxu0  ;;  %3344 = vmatmul.mubr.msk.f32.gmra.mrb[42].mxu1 %vm642_vm1, %v2170_v7 }
 0x419   : > { %v2076_v49 = vpop.f32.mrb[57].mxu0  ;;  %v2172_v9 = vmul.f32 %v3751_v18, %v3292_v14 }
 0x41a   : > { %v2171_v52 = vmul.f32 %v3749_v50, %v2076_v49 }
 0x41c   : > { %v3295_v56 = vpop.f32.mrb[58].mxu0  ;;  %3346 = vmatprep.mubr.msk.f32.mxu1 %vm642_vm1, %v2171_v52 }
 0x41d   : > { %v2086_v44 = vpop.f32.mrb[59].mxu0  ;;  %3347 = vmatmul.mubr.msk.f32.gmra.mrb[44].mxu1 %vm642_vm1, %v2172_v9  ;;  %v2174_v19 = vmul.f32 %v3755_v43, %v3295_v56 }
 0x41e   : > { %v2173_v40 = vmul.f32 %v3753_v5, %v2086_v44 }
 0x420   : > { %v3298_v61 = vpop.f32.mrb[60].mxu0  ;;  %3349 = vmatprep.mubr.msk.f32.mxu1 %vm642_vm1, %v2173_v40 }
 0x421   : > { %v2096_v37 = vpop.f32.mrb[61].mxu0  ;;  %3350 = vmatmul.mubr.msk.f32.gmra.mrb[46].mxu1 %vm642_vm1, %v2174_v19  ;;  %v2176_v38 = vmul.f32 %v3759_v39, %v3298_v61 }
 0x422   : > { %v2175_v13 = vmul.f32 %v3757_v1, %v2096_v37 }
 0x424   : > { %v3301_v54 = vpop.f32.mrb[62].mxu0  ;;  %3352 = vmatprep.mubr.msk.f32.mxu1 %vm642_vm1, %v2175_v13 }
 0x425   : > { %v2106_v42 = vpop.f32.mrb[63].mxu0  ;;  %3353 = vmatmul.mubr.msk.f32.gmra.mrb[48].mxu1 %vm642_vm1, %v2176_v38  ;;  %v2178_v35 = vmul.f32 %v3763_v10, %v3301_v54 }
 0x426   : > { %v2177_v55 = vmul.f32 %v3761_v16, %v2106_v42 }
 0x428   : > { %3355 = vmatprep.mubr.msk.f32.mxu1 %vm642_vm1, %v2177_v55 }
 0x429   : > { %3356 = vmatmul.mubr.msk.f32.gmra.mrb[50].mxu1 %vm642_vm1, %v2178_v35 }
 0x4af   : > { %v3312_v6 = vpop.f32.mrb[64].mxu0 }
 0x4b0   : > { %v2358_v51 = vadd.f32 %v3312_v6, %v4594_v58  ;;  %v2352_v32 = vpop.f32.mrb[65].mxu0 }
 0x4b1   : > { %v2353_v62 = vadd.f32 %v4594_v58, %v2352_v32 }
 0x4b2   : > { %v2512_v2 = vadd.f32 %v3764_v12, %v2358_v51  ;;  %v4772_v51 = vld [vmem:[#allocation2_spill] sm:$0xff] }
 0x4b3   : > { %v2511_v57 = vadd.f32 %v3765_v46, %v2353_v62 }
 0x4b4   : > { %2544 = vst.msk [vmem:[%s4602_s10 + $0x8] sm:$0xff] %vm280_vm0, %v2512_v2  ;;  %v4773_v2 = vld [vmem:[#allocation4_spill] sm:$0xff] }
 0x4b5   : > { %2543 = vst.msk [vmem:[%s4602_s10] sm:$0xff] %vm280_vm0, %v2511_v57  ;;  %v4774_v57 = vld [vmem:[#allocation3_spill] sm:$0xff] }
 0x4b6   : > { %v3315_v4 = vpop.f32.mrb[66].mxu0 }
 0x4b7   : > { %v2368_v36 = vadd.f32 %v3315_v4, %v4594_v58  ;;  %v2362_v53 = vpop.f32.mrb[67].mxu0 }
 0x4b8   : > { %v2363_v34 = vadd.f32 %v4594_v58, %v2362_v53 }
 0x4ba   : > { %v3318_v59 = vpop.f32.mrb[68].mxu0 }
 0x4bb   : > { %v2378_v63 = vadd.f32 %v3318_v59, %v4594_v58  ;;  %v2372_v31 = vpop.f32.mrb[69].mxu0 }
 0x4bc   : > { %v3766_v33 = vld [vmem:[%s3852_s15 + $0x18] sm:$0xff]  ;;  %v3767_v41 = vld [vmem:[%s3852_s15 + $0x10] sm:$0xff]  ;;  %v2373_v45 = vadd.f32 %v4594_v58, %v2372_v31 }
 0x4bd   : > { %v2514_v30 = vadd.f32 %v3766_v33, %v2368_v36  ;;  %v2513_v17 = vadd.f32 %v3767_v41, %v2363_v34  ;;  %v4775_v33 = vld [vmem:[#allocation6_spill] sm:$0xff]  ;;  %v4776_v41 = vld [vmem:[#allocation5_spill] sm:$0xff] }
 0x4be   : > { %v3321_v28 = vpop.f32.mrb[70].mxu0 }
 0x4bf   : > { %2546 = vst.msk [vmem:[%s4602_s10 + $0x18] sm:$0xff] %vm280_vm0, %v2514_v30  ;;  %2545 = vst.msk [vmem:[%s4602_s10 + $0x10] sm:$0xff] %vm280_vm0, %v2513_v17  ;;  %v2388_v8 = vadd.f32 %v3321_v28, %v4594_v58  ;;  %v2382_v48 = vpop.f32.mrb[71].mxu0 }
 0x4c0   : > { %v2383_v7 = vadd.f32 %v4594_v58, %v2382_v48 }
 0x4c6   : > { %v3768_v60 = vld [vmem:[%s3852_s15 + $0x28] sm:$0xff]  ;;  %v3769_v11 = vld [vmem:[%s3852_s15 + $0x20] sm:$0xff] }
 0x4c7   : > { %v2516_v3 = vadd.f32 %v3768_v60, %v2378_v63  ;;  %v2515_v47 = vadd.f32 %v3769_v11, %v2373_v45  ;;  %v4777_v60 = vld [vmem:[#allocation8_spill] sm:$0xff]  ;;  %v4778_v11 = vld [vmem:[#allocation7_spill] sm:$0xff] }
 0x4c9   : > { %2548 = vst.msk [vmem:[%s4602_s10 + $0x28] sm:$0xff] %vm280_vm0, %v2516_v3  ;;  %2547 = vst.msk [vmem:[%s4602_s10 + $0x20] sm:$0xff] %vm280_vm0, %v2515_v47 }
 0x4cf   : > { %v3324_v49 = vpop.f32.mrb[72].mxu0 }
 0x4d0   : > { %v3770_v0 = vld [vmem:[%s3852_s15 + $0x38] sm:$0xff]  ;;  %v3771_v50 = vld [vmem:[%s3852_s15 + $0x30] sm:$0xff]  ;;  %v2398_v18 = vadd.f32 %v3324_v49, %v4594_v58  ;;  %v2392_v52 = vpop.f32.mrb[73].mxu0 }
 0x4d1   : > { %v2518_v14 = vadd.f32 %v3770_v0, %v2388_v8  ;;  %v2517_v15 = vadd.f32 %v3771_v50, %v2383_v7  ;;  %v2393_v9 = vadd.f32 %v4594_v58, %v2392_v52  ;;  %v4779_v0 = vld [vmem:[#allocation10_spill] sm:$0xff]  ;;  %v4780_v50 = vld [vmem:[#allocation9_spill] sm:$0xff] }
 0x4d2   : > { %v2520_v56 = vadd.f32 %v2398_v18, %v3876_v21 }
 0x4d3   : > { %2550 = vst.msk [vmem:[%s4602_s10 + $0x38] sm:$0xff] %vm280_vm0, %v2518_v14  ;;  %2549 = vst.msk [vmem:[%s4602_s10 + $0x30] sm:$0xff] %vm280_vm0, %v2517_v15  ;;  %v2519_v5 = vadd.f32 %v2393_v9, %v3870_v20  ;;  %v3327_v44 = vpop.f32.mrb[74].mxu0 }
 0x4d4   : > { %2552 = vst.msk [vmem:[%s4602_s10 + $0x48] sm:$0xff] %vm280_vm0, %v2520_v56  ;;  %v2408_v43 = vadd.f32 %v3327_v44, %v4594_v58  ;;  %v2402_v40 = vpop.f32.mrb[75].mxu0  ;;  %v4781_v56 = vld [vmem:[#allocation12_spill] sm:$0xff]  ;;  %v4782_v44 = vld [vmem:[#allocation11_spill] sm:$0xff] }
 0x4d5   : > { %2551 = vst.msk [vmem:[%s4602_s10 + $0x40] sm:$0xff] %vm280_vm0, %v2519_v5  ;;  %v2403_v19 = vadd.f32 %v4594_v58, %v2402_v40 }
 0x4d6   : > { %v2522_v61 = vadd.f32 %v2408_v43, %v3886_v23 }
 0x4d7   : > { %v2521_v1 = vadd.f32 %v2403_v19, %v3879_v22  ;;  %v3330_v37 = vpop.f32.mrb[32].mxu1 }
 0x4d8   : > { %2554 = vst.msk [vmem:[%s4602_s10 + $0x58] sm:$0xff] %vm280_vm0, %v2522_v61  ;;  %v2418_v20 = vadd.f32 %v3330_v37, %v4594_v58  ;;  %v2412_v21 = vpop.f32.mrb[33].mxu1  ;;  %v4783_v37 = vld [vmem:[#allocation14_spill] sm:$0xff] }
 0x4d9   : > { %2553 = vst.msk [vmem:[%s4602_s10 + $0x50] sm:$0xff] %vm280_vm0, %v2521_v1  ;;  %v2413_v39 = vadd.f32 %v4594_v58, %v2412_v21  ;;  %v4784_v21 = vld [vmem:[#allocation13_spill] sm:$0xff] }
 0x4da   : > { %v2524_v13 = vadd.f32 %v2418_v20, %v3896_v25 }
 0x4db   : > { %v2523_v38 = vadd.f32 %v2413_v39, %v3889_v24  ;;  %v3333_v54 = vpop.f32.mrb[34].mxu1 }
 0x4dc   : > { %2556 = vst.msk [vmem:[%s4602_s10 + $0x68] sm:$0xff] %vm280_vm0, %v2524_v13  ;;  %v2428_v22 = vadd.f32 %v3333_v54, %v4594_v58  ;;  %v2422_v23 = vpop.f32.mrb[35].mxu1 }
 0x4dd   : > { %2555 = vst.msk [vmem:[%s4602_s10 + $0x60] sm:$0xff] %vm280_vm0, %v2523_v38  ;;  %v2423_v16 = vadd.f32 %v4594_v58, %v2422_v23  ;;  %v4785_v23 = vld [vmem:[#allocation16_spill] sm:$0xff] }
 0x4de   : > { %v2526_v42 = vadd.f32 %v2428_v22, %v3906_v27 }
 0x4df   : > { %v2525_v10 = vadd.f32 %v2423_v16, %v3899_v26  ;;  %v3336_v55 = vpop.f32.mrb[36].mxu1 }
 0x4e0   : > { %2558 = vst.msk [vmem:[%s4602_s10 + $0x78] sm:$0xff] %vm280_vm0, %v2526_v42  ;;  %v2438_v24 = vadd.f32 %v3336_v55, %v4594_v58  ;;  %v2432_v25 = vpop.f32.mrb[37].mxu1  ;;  %v4786_v42 = vld [vmem:[#allocation15_spill] sm:$0xff] }
 0x4e1   : > { %2557 = vst.msk [vmem:[%s4602_s10 + $0x70] sm:$0xff] %vm280_vm0, %v2525_v10  ;;  %v2433_v35 = vadd.f32 %v4594_v58, %v2432_v25 }
 0x4e2   : > { %v2528_v6 = vadd.f32 %v2438_v24, %v3916_v29 }
 0x4e3   : > { %v2527_v32 = vadd.f32 %v2433_v35, %v4772_v51  ;;  %v3339_v62 = vpop.f32.mrb[38].mxu1 }
 0x4e4   : > { %2560 = vst.msk [vmem:[%s4602_s10 + $0x88] sm:$0xff] %vm280_vm0, %v2528_v6  ;;  %v2448_v26 = vadd.f32 %v3339_v62, %v4594_v58  ;;  %v2442_v27 = vpop.f32.mrb[39].mxu1 }
 0x4e5   : > { %2559 = vst.msk [vmem:[%s4602_s10 + $0x80] sm:$0xff] %vm280_vm0, %v2527_v32  ;;  %v2443_v12 = vadd.f32 %v4594_v58, %v2442_v27 }
 0x4e6   : > { %v2530_v46 = vadd.f32 %v2448_v26, %v4773_v2 }
 0x4e7   : > { %v2529_v4 = vadd.f32 %v2443_v12, %v4774_v57  ;;  %v3342_v36 = vpop.f32.mrb[40].mxu1 }
 0x4e8   : > { %2562 = vst.msk [vmem:[%s4602_s10 + $0x98] sm:$0xff] %vm280_vm0, %v2530_v46  ;;  %v2458_v29 = vadd.f32 %v3342_v36, %v4594_v58  ;;  %v2452_v53 = vpop.f32.mrb[41].mxu1 }
 0x4e9   : > { %2561 = vst.msk [vmem:[%s4602_s10 + $0x90] sm:$0xff] %vm280_vm0, %v2529_v4  ;;  %v2453_v34 = vadd.f32 %v4594_v58, %v2452_v53 }
 0x4ea   : > { %v2532_v30 = vadd.f32 %v2458_v29, %v4775_v33 }
 0x4eb   : > { %v2531_v17 = vadd.f32 %v2453_v34, %v4776_v41  ;;  %v3345_v59 = vpop.f32.mrb[42].mxu1 }
 0x4ec   : > { %2564 = vst.msk [vmem:[%s4602_s10 + $0xa8] sm:$0xff] %vm280_vm0, %v2532_v30  ;;  %v2468_v63 = vadd.f32 %v3345_v59, %v4594_v58  ;;  %v2462_v31 = vpop.f32.mrb[43].mxu1 }
 0x4ed   : > { %2563 = vst.msk [vmem:[%s4602_s10 + $0xa0] sm:$0xff] %vm280_vm0, %v2531_v17  ;;  %v2463_v45 = vadd.f32 %v4594_v58, %v2462_v31 }
 0x4ee   : > { %v2534_v3 = vadd.f32 %v2468_v63, %v4777_v60 }
 0x4ef   : > { %v2533_v47 = vadd.f32 %v2463_v45, %v4778_v11 }
 0x4f0   : > { %2566 = vst.msk [vmem:[%s4602_s10 + $0xb8] sm:$0xff] %vm280_vm0, %v2534_v3  ;;  %v3348_v28 = vpop.f32.mrb[44].mxu1 }
 0x4f1   : > { %2565 = vst.msk [vmem:[%s4602_s10 + $0xb0] sm:$0xff] %vm280_vm0, %v2533_v47  ;;  %v2478_v8 = vadd.f32 %v3348_v28, %v4594_v58  ;;  %v2472_v48 = vpop.f32.mrb[45].mxu1 }
 0x4f2   : > { %v2473_v7 = vadd.f32 %v4594_v58, %v2472_v48 }
 0x4f3   : > { %v2536_v14 = vadd.f32 %v2478_v8, %v4779_v0 }
 0x4f4   : > { %v2535_v15 = vadd.f32 %v2473_v7, %v4780_v50  ;;  %v3351_v49 = vpop.f32.mrb[46].mxu1 }
 0x4f5   : > { %2568 = vst.msk [vmem:[%s4602_s10 + $0xc8] sm:$0xff] %vm280_vm0, %v2536_v14  ;;  %v2488_v18 = vadd.f32 %v3351_v49, %v4594_v58  ;;  %v2482_v52 = vpop.f32.mrb[47].mxu1 }
 0x4f6   : > { %2567 = vst.msk [vmem:[%s4602_s10 + $0xc0] sm:$0xff] %vm280_vm0, %v2535_v15  ;;  %v2483_v9 = vadd.f32 %v4594_v58, %v2482_v52 }
 0x4f7   : > { %v2538_v5 = vadd.f32 %v2488_v18, %v4781_v56 }
 0x4f8   : > { %v2537_v43 = vadd.f32 %v2483_v9, %v4782_v44  ;;  %v3354_v40 = vpop.f32.mrb[48].mxu1 }
 0x4f9   : > { %2570 = vst.msk [vmem:[%s4602_s10 + $0xd8] sm:$0xff] %vm280_vm0, %v2538_v5  ;;  %v2498_v19 = vadd.f32 %v3354_v40, %v4594_v58  ;;  %v2492_v61 = vpop.f32.mrb[49].mxu1 }
 0x4fa   : > { %2569 = vst.msk [vmem:[%s4602_s10 + $0xd0] sm:$0xff] %vm280_vm0, %v2537_v43  ;;  %v2493_v1 = vadd.f32 %v4594_v58, %v2492_v61 }
 0x4fb   : > { %v2540_v20 = vadd.f32 %v2498_v19, %v4783_v37 }
 0x4fc   : > { %v2539_v39 = vadd.f32 %v2493_v1, %v4784_v21  ;;  %v3357_v13 = vpop.f32.mrb[50].mxu1 }
 0x4fd   : > { %2572 = vst.msk [vmem:[%s4602_s10 + $0xe8] sm:$0xff] %vm280_vm0, %v2540_v20  ;;  %v2508_v38 = vadd.f32 %v3357_v13, %v4594_v58  ;;  %v2502_v54 = vpop.f32.mrb[51].mxu1 }
 0x4fe   : > { %2571 = vst.msk [vmem:[%s4602_s10 + $0xe0] sm:$0xff] %vm280_vm0, %v2539_v39  ;;  %v2503_v22 = vadd.f32 %v4594_v58, %v2502_v54 }
 0x4ff   : > { %v2542_v16 = vadd.f32 %v2508_v38, %v4785_v23 }
 0x500   : > { %v2541_v10 = vadd.f32 %v2503_v22, %v4786_v42 }
 0x501   : > { %2574 = vst.msk [vmem:[%s4602_s10 + $0xf8] sm:$0xff] %vm280_vm0, %v2542_v16 }
 0x502   : > { %2573 = vst.msk [vmem:[%s4602_s10 + $0xf0] sm:$0xff] %vm280_vm0, %v2541_v10 }
 0x503 PF: > { %s15_s18 = sadd.s32 1, %s3778_s18  }
 0x504   : > { %p12_p4 = scmp.ge.s32.totalorder %s15_s18, 4  }
 0x506   :  { %14 = sbr.rel (!%p12_p4) target bundleno = 1 (0x1), region = 70 }

</bundles_post_ra>
